<compile_context>
chip_gen: v7x
topology: tpu7x:2x2x1
jax: 0.10.0
libtpu: 0.0.40
codegen_flags: <defaults>
</compile_context>

<pallas_src>
import random

import jax
import jax.numpy as jnp
from jax import lax
from jax.experimental import pallas as pl
from jax.experimental.pallas import tpu as pltpu


# ----------------------------------------------------------------------------
# helpers
# ----------------------------------------------------------------------------
def _round_up(x, m):
    return ((x + m - 1) // m) * m


def _pad2(x, rows, cols):
    return jnp.pad(x, ((0, rows - x.shape[0]), (0, cols - x.shape[1])))


def _pad_gate_weight(w, in_pad, h, hp):
    """Pad an LSTM weight [in, 4H] -> [in_pad, 4*Hp], padding each gate block separately."""
    inn = w.shape[0]
    w4 = w.reshape(inn, 4, h)
    w4 = jnp.pad(w4, ((0, in_pad - inn), (0, 0), (0, hp - h)))
    return w4.reshape(in_pad, 4 * hp)


# ----------------------------------------------------------------------------
# Single fused kernel: encoder loop + attention/decoder loop, no grid.
# ----------------------------------------------------------------------------
def _seq2seq_kernel(tf_ref,                                   # SMEM (T-1,) int32
                    emb_src_ref, mask_ref,                    # (S,Bp,Ep) bf16, (S,Bp,1) f32
                    enc_w_ref, enc_b_ref,                     # (Ep+Hp,4Hp) bf16, (1,4Hp) f32
                    w_enc_ref, attn_b_ref,                    # (Hp,Hp) bf16, (1,Hp) f32
                    w_hd_ref, attn_v_ref,                     # (Hp,Hp) bf16, (Hp,1) f32
                    emb_trg_ref, trg_ref,                     # (Vp,Ep) bf16, (T,Bp,1) int32
                    dec_w_ref, dec_b_ref,                     # (Ep+2Hp,4Hp) bf16, (1,4Hp) f32
                    fc_w_ref, fc_b_ref,                       # (Ep+2Hp,Vp) bf16, (1,Vp) f32
                    out_ref,                                  # (T,Bp,Vp) f32
                    enc_h_sc, enc_p_sc, xcat_sc):             # scratch
    S, Bp, Hp = enc_h_sc.shape
    Ep = emb_src_ref.shape[2]
    Vp = fc_b_ref.shape[1]
    T = out_ref.shape[0]
    f32 = jnp.float32
    bf16 = jnp.bfloat16

    def lstm_gates(gates, c):
        i_g = jax.nn.sigmoid(gates[:, 0 * Hp:1 * Hp])
        f_g = jax.nn.sigmoid(gates[:, 1 * Hp:2 * Hp])
        g_g = jnp.tanh(gates[:, 2 * Hp:3 * Hp])
        o_g = jax.nn.sigmoid(gates[:, 3 * Hp:4 * Hp])
        c_new = f_g * c + i_g * g_g
        h_new = o_g * jnp.tanh(c_new)
        return h_new, c_new

    # ------------------------- encoder time loop ---------------------------
    def enc_step(t, carry):
        h, c = carry
        # stacked-K LSTM input: [x | h] in one bf16 scratch, single MXU matmul
        xcat_sc[:, :Ep] = emb_src_ref[t]
        xcat_sc[:, Ep:Ep + Hp] = h.astype(bf16)
        gates = (jnp.dot(xcat_sc[:, :Ep + Hp], enc_w_ref[...],
                         preferred_element_type=f32) + enc_b_ref[...])
        h_new, c_new = lstm_gates(gates, c)
        hm = h_new * mask_ref[t]                              # src_mask on stored outputs
        enc_h_sc[t] = hm
        # hoisted encoder-side half of the additive attention
        enc_p_sc[t] = (jnp.dot(hm.astype(bf16), w_enc_ref[...],
                               preferred_element_type=f32) + attn_b_ref[...])
        return h_new, c_new

    zeros_bh = jnp.zeros((Bp, Hp), f32)
    h_enc, c_enc = lax.fori_loop(0, S, enc_step, (zeros_bh, zeros_bh))

    # --------------------------- decode loop --------------------------------
    out_ref[0] = jnp.zeros((Bp, Vp), f32)                     # outputs[0] stays zero
    col = lax.broadcasted_iota(jnp.int32, (Bp, Vp), 1)        # hoisted out of the loop
    col_f = col.astype(f32)
    mask_all = mask_ref[...]                                  # (S,Bp,1), hoisted

    def dec_step(i, carry):
        h, c, tok = carry                                     # (Bp,Hp) f32 x2, (Bp,1) int32

        # embedding lookup as one-hot @ table (MXU); TODO(synk): SMEM row gather for big V
        onehot = (col == tok).astype(bf16)                    # (Bp, Vp)
        emb = jnp.dot(onehot, emb_trg_ref[...], preferred_element_type=f32)   # (Bp, Ep)

        # additive attention (encoder half precomputed in enc_p_sc)
        h_proj = jnp.dot(h.astype(bf16), w_hd_ref[...], preferred_element_type=f32)
        energy = jnp.tanh(h_proj[None, :, :] + enc_p_sc[...])                 # (S,Bp,Hp)
        score = jnp.dot(energy.reshape(S * Bp, Hp), attn_v_ref[...],
                        preferred_element_type=f32).reshape(S, Bp, 1)         # MXU, not VPU+XLU
        score = jnp.where(mask_all > 0, score, -1e10)
        score = score - jnp.max(score, axis=0, keepdims=True)
        e = jnp.exp(score)
        attn = e / jnp.sum(e, axis=0, keepdims=True)          # exact softmax
        ctx = jnp.sum(attn * enc_h_sc[...], axis=0)                           # (Bp, Hp)

        # stacked-K LSTM gates: [emb | ctx | h] @ W  (single MXU matmul)
        xcat_sc[:, :Ep] = emb.astype(bf16)
        xcat_sc[:, Ep:Ep + Hp] = ctx.astype(bf16)
        xcat_sc[:, Ep + Hp:] = h.astype(bf16)
        gates = (jnp.dot(xcat_sc[...], dec_w_ref[...],
                         preferred_element_type=f32) + dec_b_ref[...])
        h_new, c_new = lstm_gates(gates, c)

        # stacked-K vocab projection: [emb | ctx | h_new] @ W_fc (single MXU matmul)
        xcat_sc[:, Ep + Hp:] = h_new.astype(bf16)
        logits = (jnp.dot(xcat_sc[...], fc_w_ref[...],
                          preferred_element_type=f32) + fc_b_ref[...])        # (Bp, Vp)
        out_ref[i + 1] = logits

        # greedy argmax (padded vocab columns already carry -1e30 via fc_b; first-max index)
        mx = jnp.max(logits, axis=-1, keepdims=True)
        cand = jnp.where(logits >= mx, col_f, float(Vp))
        top1 = jnp.min(cand, axis=-1, keepdims=True).astype(jnp.int32)        # (Bp, 1)

        # teacher forcing select (scalar flag from SMEM, no per-step DMA)
        next_tok = jnp.where(tf_ref[i] > 0, trg_ref[i + 1], top1)
        return h_new, c_new, next_tok

    tok0 = trg_ref[0]
    lax.fori_loop(0, T - 1, dec_step, (h_enc, c_enc, tok0))


# ----------------------------------------------------------------------------
# Jitted forward: padding / bf16 repacking + one fused pallas_call
# ----------------------------------------------------------------------------
@jax.jit
def _forward_impl(params, src, src_mask, trg, tf_vec):
    S, B = src.shape
    T = trg.shape[0]
    E = params['emb_src'].shape[1]
    H = params['enc_whh'].shape[0]
    V = params['fc_w'].shape[1]

    Bp = _round_up(max(B, 8), 8)
    Ep = _round_up(E, 128)
    Hp = _round_up(H, 128)
    Vp = _round_up(V, 128)
    bf16 = jnp.bfloat16

    # ---- weights: stacked-K layouts, zero-padded per gate, bf16 for MXU operands ----
    enc_w = jnp.concatenate([
        _pad_gate_weight(params['enc_wih'], Ep, H, Hp),        # x rows
        _pad_gate_weight(params['enc_whh'], Hp, H, Hp),        # h rows
    ], axis=0).astype(bf16)                                    # (Ep+Hp, 4Hp)
    enc_b = _pad_gate_weight(params['enc_b'], 1, H, Hp)        # (1, 4Hp) f32

    attn_w = params['attn_w']                                  # [2H, H] = [h part | enc part]
    w_hd = _pad2(attn_w[:H], Hp, Hp).astype(bf16)
    w_enc = _pad2(attn_w[H:], Hp, Hp).astype(bf16)
    attn_b = _pad2(params['attn_b'], 1, Hp)                    # f32
    attn_v = _pad2(jnp.transpose(params['attn_v']), Hp, 1)     # (Hp, 1) f32

    dec_wih = params['dec_wih']                                # [E+H, 4H] rows = [emb | ctx]
    dec_w = jnp.concatenate([
        _pad_gate_weight(dec_wih[:E], Ep, H, Hp),              # emb rows
        _pad_gate_weight(dec_wih[E:], Hp, H, Hp),              # ctx rows
        _pad_gate_weight(params['dec_whh'], Hp, H, Hp),        # h rows
    ], axis=0).astype(bf16)                                    # (Ep+2Hp, 4Hp)
    dec_b = _pad_gate_weight(params['dec_b'], 1, H, Hp)        # (1, 4Hp) f32

    fc_w = params['fc_w']                                      # [2H+E, V] rows = [h | ctx | emb]
    fc_stack = jnp.concatenate([
        _pad2(fc_w[2 * H:], Ep, Vp),                           # emb rows (match xcat layout)
        _pad2(fc_w[H:2 * H], Hp, Vp),                          # ctx rows
        _pad2(fc_w[:H], Hp, Vp),                               # h rows
    ], axis=0).astype(bf16)                                    # (Ep+2Hp, Vp)
    fc_b = _pad2(params['fc_b'], 1, Vp)
    col_ids = jnp.arange(Vp)[None, :]
    fc_b = jnp.where(col_ids < V, fc_b, -1e30)                 # bake vocab-padding mask

    emb_trg = _pad2(params['emb_trg'], Vp, Ep).astype(bf16)    # (Vp, Ep)

    # ---- activations / per-step data ----
    emb_src = jnp.take(params['emb_src'], src, axis=0)         # (S, B, E)
    emb_src = jnp.pad(emb_src, ((0, 0), (0, Bp - B), (0, Ep - E))).astype(bf16)
    mask = _pad2(jnp.transpose(src_mask), S, Bp)[:, :, None].astype(jnp.float32)   # (S,Bp,1)
    trg_p = jnp.pad(trg, ((0, 0), (0, Bp - B))).astype(jnp.int32)[:, :, None]      # (T,Bp,1)
    tf_i32 = tf_vec.astype(jnp.int32)                          # (T-1,) -> SMEM

    smem = pl.BlockSpec(memory_space=pltpu.MemorySpace.SMEM)
    vmem = pl.BlockSpec(memory_space=pltpu.MemorySpace.VMEM)

    out = pl.pallas_call(
        _seq2seq_kernel,
        out_shape=jax.ShapeDtypeStruct((T, Bp, Vp), jnp.float32),
        in_specs=[smem] + [vmem] * 14,
        out_specs=vmem,
        scratch_shapes=[
            pltpu.VMEM((S, Bp, Hp), jnp.float32),              # masked encoder hidden states
            pltpu.VMEM((S, Bp, Hp), jnp.float32),              # encoder attention projection
            pltpu.VMEM((Bp, Ep + 2 * Hp), jnp.bfloat16),       # stacked-K matmul operand
        ],
        compiler_params=pltpu.CompilerParams(vmem_limit_bytes=32 * 1024 * 1024),
    )(tf_i32, emb_src, mask, enc_w, enc_b, w_enc, attn_b, w_hd, attn_v,
      emb_trg, trg_p, dec_w, dec_b, fc_stack, fc_b)

    return out[:, :B, :V]


def seq2seq_attn_forward(params, src, src_mask, trg, teacher_forcing_ratio=0.5):
    """Mirrors Seq2SeqAttn.forward: outputs [max_len, B, trg_vocab]; outputs[0] stays zero."""
    max_len = trg.shape[0]
    # host-side random draws (one per decode step, same order as the PyTorch loop)
    tf_vec = jnp.asarray(
        [1 if random.random() < teacher_forcing_ratio else 0
         for _ in range(max_len - 1)], dtype=jnp.int32)
    return _forward_impl(params, src, src_mask, trg, tf_vec)


# ----------------------------------------------------------------------------
# Deterministic parameter init (synthetic weights; no checkpoint loading)
# ----------------------------------------------------------------------------
def init_params(key, src_vocab, trg_vocab, emb_dim, hid_dim):
    ks = jax.random.split(key, 12)
    s = 0.1
    return {
        'emb_src': jax.random.normal(ks[0], (src_vocab, emb_dim), jnp.float32) * s,
        'enc_wih': jax.random.normal(ks[1], (emb_dim, 4 * hid_dim), jnp.float32) * s,
        'enc_whh': jax.random.normal(ks[2], (hid_dim, 4 * hid_dim), jnp.float32) * s,
        'enc_b':   jax.random.normal(ks[3], (1, 4 * hid_dim), jnp.float32) * s,
        'emb_trg': jax.random.normal(ks[4], (trg_vocab, emb_dim), jnp.float32) * s,
        'attn_w':  jax.random.normal(ks[5], (2 * hid_dim, hid_dim), jnp.float32) * s,
        'attn_b':  jax.random.normal(ks[6], (1, hid_dim), jnp.float32) * s,
        'attn_v':  jax.random.normal(ks[7], (1, hid_dim), jnp.float32) * s,
        'dec_wih': jax.random.normal(ks[8], (emb_dim + hid_dim, 4 * hid_dim), jnp.float32) * s,
        'dec_whh': jax.random.normal(ks[9], (hid_dim, 4 * hid_dim), jnp.float32) * s,
        'dec_b':   jax.random.normal(ks[10], (1, 4 * hid_dim), jnp.float32) * s,
        'fc_w':    jax.random.normal(ks[11], (2 * hid_dim + emb_dim, trg_vocab), jnp.float32) * s,
        'fc_b':    jnp.zeros((1, trg_vocab), jnp.float32),
    }


if __name__ == "__main__":
    SRC_LEN, TRG_LEN, B = 8, 8, 2
    SRC_VOCAB, TRG_VOCAB = 20, 20
    EMB, HID = 16, 32

    random.seed(0)  # deterministic teacher forcing (mirrors random.random() in the module)

    key = jax.random.PRNGKey(0)
    kp, ks, kt = jax.random.split(key, 3)
    params = init_params(kp, SRC_VOCAB, TRG_VOCAB, EMB, HID)

    src = jax.random.randint(ks, (SRC_LEN, B), 0, SRC_VOCAB, dtype=jnp.int32)
    trg = jax.random.randint(kt, (TRG_LEN, B), 0, TRG_VOCAB, dtype=jnp.int32)
    src_mask = jnp.ones((B, SRC_LEN), jnp.float32)  # no padding in this synthetic example

    outputs = seq2seq_attn_forward(params, src, src_mask, trg, teacher_forcing_ratio=0.5)
    outputs = jax.block_until_ready(outputs)

    assert outputs.shape == (TRG_LEN, B, TRG_VOCAB)
    assert bool(jnp.all(jnp.isfinite(outputs)))
    assert bool(jnp.all(outputs[0] == 0.0))  # outputs[0] stays zero, as in the PyTorch module
    print("KERNEL_OK")
</pallas_src>

<mosaic_0001>
module attributes {stable_mosaic.version = 11 : i64} {
  func.func @_seq2seq_kernel(%arg0: memref<7xi32, #tpu.memory_space<smem>>, %arg1: memref<8x8x128xbf16, #tpu.memory_space<vmem>>, %arg2: memref<8x8x1xf32, #tpu.memory_space<vmem>>, %arg3: memref<256x512xbf16, #tpu.memory_space<vmem>>, %arg4: memref<1x512xf32, #tpu.memory_space<vmem>>, %arg5: memref<128x128xbf16, #tpu.memory_space<vmem>>, %arg6: memref<1x128xf32, #tpu.memory_space<vmem>>, %arg7: memref<128x128xbf16, #tpu.memory_space<vmem>>, %arg8: memref<128x1xf32, #tpu.memory_space<vmem>>, %arg9: memref<128x128xbf16, #tpu.memory_space<vmem>>, %arg10: memref<8x8x1xi32, #tpu.memory_space<vmem>>, %arg11: memref<384x512xbf16, #tpu.memory_space<vmem>>, %arg12: memref<1x512xf32, #tpu.memory_space<vmem>>, %arg13: memref<384x128xbf16, #tpu.memory_space<vmem>>, %arg14: memref<1x128xf32, #tpu.memory_space<vmem>>, %arg15: memref<8x8x128xf32, #tpu.memory_space<vmem>>, %arg16: memref<8x8x128xf32, #tpu.memory_space<vmem>>, %arg17: memref<8x8x128xf32, #tpu.memory_space<vmem>>, %arg18: memref<8x384xbf16, #tpu.memory_space<vmem>>) attributes {dimension_semantics = [], scalar_prefetch = 0 : i64, scratch_operands = 3 : i64, tpu.core_type = #tpu.core_type<tc>} {
    %cst = arith.constant 0.000000e+00 : f32
    %0 = vector.broadcast %cst : f32 to vector<8x128xf32>
    %c0_i32 = arith.constant 0 : i32
    %c8_i32 = arith.constant 8 : i32
    %1 = arith.addi %c0_i32, %c8_i32 : i32
    %c1_i32 = arith.constant 1 : i32
    %2:2 = scf.for %arg19 = %c0_i32 to %1 step %c1_i32 iter_args(%arg20 = %0, %arg21 = %0) -> (vector<8x128xf32>, vector<8x128xf32>)  : i32 {
      %14 = arith.index_cast %arg19 : i32 to index
      %c0_13 = arith.constant 0 : index
      %c0_14 = arith.constant 0 : index
      %15 = vector.load %arg1[%14, %c0_13, %c0_14] : memref<8x8x128xbf16, #tpu.memory_space<vmem>>, vector<1x8x128xbf16>
      %16 = vector.shape_cast %15 : vector<1x8x128xbf16> to vector<8x128xbf16>
      %c0_15 = arith.constant 0 : index
      %c0_16 = arith.constant 0 : index
      %17 = vector.load %arg18[%c0_15, %c0_16] : memref<8x384xbf16, #tpu.memory_space<vmem>>, vector<8x128xbf16>
      tpu.vector_store %arg18[%c0_15, %c0_16], %16 {strides = array<i32>} : memref<8x384xbf16, #tpu.memory_space<vmem>>, vector<8x128xbf16>,
      %18 = arith.truncf %arg20 : vector<8x128xf32> to vector<8x128xbf16>
      %c0_17 = arith.constant 0 : index
      %c128 = arith.constant 128 : index
      %19 = vector.load %arg18[%c0_17, %c128] : memref<8x384xbf16, #tpu.memory_space<vmem>>, vector<8x128xbf16>
      tpu.vector_store %arg18[%c0_17, %c128], %18 {strides = array<i32>} : memref<8x384xbf16, #tpu.memory_space<vmem>>, vector<8x128xbf16>,
      %c0_18 = arith.constant 0 : index
      %c0_19 = arith.constant 0 : index
      %20 = vector.load %arg18[%c0_18, %c0_19] : memref<8x384xbf16, #tpu.memory_space<vmem>>, vector<8x256xbf16>
      %c0_20 = arith.constant 0 : index
      %c0_21 = arith.constant 0 : index
      %21 = vector.load %arg3[%c0_20, %c0_21] : memref<256x512xbf16, #tpu.memory_space<vmem>>, vector<256x512xbf16>
      %cst_22 = arith.constant dense<0.000000e+00> : vector<8x512xf32>
      %22 = tpu.matmul %20, %21, %cst_22 {dimension_numbers = #tpu.dot_dimension_numbers<[1], [0], [0], [1], [0, 0, 1, 1], [], []>} : vector<8x256xbf16>, vector<256x512xbf16>, vector<8x512xf32> -> vector<8x512xf32>
      %c0_23 = arith.constant 0 : index
      %c0_24 = arith.constant 0 : index
      %23 = vector.load %arg4[%c0_23, %c0_24] : memref<1x512xf32, #tpu.memory_space<vmem>>, vector<1x512xf32>
      %24 = vector.broadcast %23 : vector<1x512xf32> to vector<8x512xf32>
      %25 = arith.addf %22, %24 : vector<8x512xf32>
      %26 = vector.extract_strided_slice %25 {offsets = [0, 0], sizes = [8, 128], strides = [1, 1]} : vector<8x512xf32> to vector<8x128xf32>
      %27 = arith.negf %26 : vector<8x128xf32>
      %28 = math.exp %27 : vector<8x128xf32>
      %cst_25 = arith.constant 1.000000e+00 : f32
      %29 = vector.broadcast %cst_25 : f32 to vector<8x128xf32>
      %30 = arith.addf %29, %28 : vector<8x128xf32>
      %31 = arith.divf %29, %30 : vector<8x128xf32>
      %32 = vector.extract_strided_slice %25 {offsets = [0, 128], sizes = [8, 128], strides = [1, 1]} : vector<8x512xf32> to vector<8x128xf32>
      %33 = arith.negf %32 : vector<8x128xf32>
      %34 = math.exp %33 : vector<8x128xf32>
      %cst_26 = arith.constant 1.000000e+00 : f32
      %35 = vector.broadcast %cst_26 : f32 to vector<8x128xf32>
      %36 = arith.addf %35, %34 : vector<8x128xf32>
      %37 = arith.divf %35, %36 : vector<8x128xf32>
      %38 = vector.extract_strided_slice %25 {offsets = [0, 256], sizes = [8, 128], strides = [1, 1]} : vector<8x512xf32> to vector<8x128xf32>
      %39 = math.tanh %38 : vector<8x128xf32>
      %40 = vector.extract_strided_slice %25 {offsets = [0, 384], sizes = [8, 128], strides = [1, 1]} : vector<8x512xf32> to vector<8x128xf32>
      %41 = arith.negf %40 : vector<8x128xf32>
      %42 = math.exp %41 : vector<8x128xf32>
      %cst_27 = arith.constant 1.000000e+00 : f32
      %43 = vector.broadcast %cst_27 : f32 to vector<8x128xf32>
      %44 = arith.addf %43, %42 : vector<8x128xf32>
      %45 = arith.divf %43, %44 : vector<8x128xf32>
      %46 = arith.mulf %37, %arg21 : vector<8x128xf32>
      %47 = arith.mulf %31, %39 : vector<8x128xf32>
      %48 = arith.addf %46, %47 : vector<8x128xf32>
      %49 = math.tanh %48 : vector<8x128xf32>
      %50 = arith.mulf %45, %49 : vector<8x128xf32>
      %51 = arith.index_cast %arg19 : i32 to index
      %c0_28 = arith.constant 0 : index
      %c0_29 = arith.constant 0 : index
      %52 = vector.load %arg2[%51, %c0_28, %c0_29] : memref<8x8x1xf32, #tpu.memory_space<vmem>>, vector<1x8x1xf32>
      %53 = vector.shape_cast %52 : vector<1x8x1xf32> to vector<8x1xf32>
      %54 = vector.broadcast %53 : vector<8x1xf32> to vector<8x128xf32>
      %55 = arith.mulf %50, %54 : vector<8x128xf32>
      %56 = arith.index_cast %arg19 : i32 to index
      %c0_30 = arith.constant 0 : index
      %c0_31 = arith.constant 0 : index
      %57 = vector.load %arg16[%56, %c0_30, %c0_31] : memref<8x8x128xf32, #tpu.memory_space<vmem>>, vector<1x8x128xf32>
      %58 = vector.shape_cast %57 : vector<1x8x128xf32> to vector<8x128xf32>
      %59 = vector.shape_cast %55 : vector<8x128xf32> to vector<1x8x128xf32>
      tpu.vector_store %arg16[%56, %c0_30, %c0_31], %59 {strides = array<i32>} : memref<8x8x128xf32, #tpu.memory_space<vmem>>, vector<1x8x128xf32>,
      %60 = arith.truncf %55 : vector<8x128xf32> to vector<8x128xbf16>
      %c0_32 = arith.constant 0 : index
      %c0_33 = arith.constant 0 : index
      %61 = vector.load %arg5[%c0_32, %c0_33] : memref<128x128xbf16, #tpu.memory_space<vmem>>, vector<128x128xbf16>
      %cst_34 = arith.constant dense<0.000000e+00> : vector<8x128xf32>
      %62 = tpu.matmul %60, %61, %cst_34 {dimension_numbers = #tpu.dot_dimension_numbers<[1], [0], [0], [1], [0, 0, 1, 1], [], []>} : vector<8x128xbf16>, vector<128x128xbf16>, vector<8x128xf32> -> vector<8x128xf32>
      %c0_35 = arith.constant 0 : index
      %c0_36 = arith.constant 0 : index
      %63 = vector.load %arg6[%c0_35, %c0_36] : memref<1x128xf32, #tpu.memory_space<vmem>>, vector<1x128xf32>
      %64 = vector.broadcast %63 : vector<1x128xf32> to vector<8x128xf32>
      %65 = arith.addf %62, %64 : vector<8x128xf32>
      %66 = arith.index_cast %arg19 : i32 to index
      %c0_37 = arith.constant 0 : index
      %c0_38 = arith.constant 0 : index
      %67 = vector.load %arg17[%66, %c0_37, %c0_38] : memref<8x8x128xf32, #tpu.memory_space<vmem>>, vector<1x8x128xf32>
      %68 = vector.shape_cast %67 : vector<1x8x128xf32> to vector<8x128xf32>
      %69 = vector.shape_cast %65 : vector<8x128xf32> to vector<1x8x128xf32>
      tpu.vector_store %arg17[%66, %c0_37, %c0_38], %69 {strides = array<i32>} : memref<8x8x128xf32, #tpu.memory_space<vmem>>, vector<1x8x128xf32>,
      scf.yield %50, %48 : vector<8x128xf32>, vector<8x128xf32>
    }
    %c8_i32_0 = arith.constant 8 : i32
    %cst_1 = arith.constant 0.000000e+00 : f32
    %3 = vector.broadcast %cst_1 : f32 to vector<8x128xf32>
    %c0 = arith.constant 0 : index
    %c0_2 = arith.constant 0 : index
    %c0_3 = arith.constant 0 : index
    %4 = vector.load %arg15[%c0, %c0_2, %c0_3] : memref<8x8x128xf32, #tpu.memory_space<vmem>>, vector<1x8x128xf32>
    %5 = vector.shape_cast %4 : vector<1x8x128xf32> to vector<8x128xf32>
    %6 = vector.shape_cast %3 : vector<8x128xf32> to vector<1x8x128xf32>
    tpu.vector_store %arg15[%c0, %c0_2, %c0_3], %6 {strides = array<i32>} : memref<8x8x128xf32, #tpu.memory_space<vmem>>, vector<1x8x128xf32>,
    %7 = tpu.iota {dimensions = array<i32: 1>} : vector<8x128xi32>
    %8 = arith.sitofp %7 : vector<8x128xi32> to vector<8x128xf32>
    %c0_4 = arith.constant 0 : index
    %c0_5 = arith.constant 0 : index
    %c0_6 = arith.constant 0 : index
    %9 = vector.load %arg2[%c0_4, %c0_5, %c0_6] : memref<8x8x1xf32, #tpu.memory_space<vmem>>, vector<8x8x1xf32>
    %c0_7 = arith.constant 0 : index
    %c0_8 = arith.constant 0 : index
    %c0_9 = arith.constant 0 : index
    %10 = vector.load %arg10[%c0_7, %c0_8, %c0_9] : memref<8x8x1xi32, #tpu.memory_space<vmem>>, vector<1x8x1xi32>
    %11 = vector.shape_cast %10 : vector<1x8x1xi32> to vector<8x1xi32>
    %c0_i32_10 = arith.constant 0 : i32
    %c7_i32 = arith.constant 7 : i32
    %12 = arith.addi %c0_i32_10, %c7_i32 : i32
    %c1_i32_11 = arith.constant 1 : i32
    %13:3 = scf.for %arg19 = %c0_i32_10 to %12 step %c1_i32_11 iter_args(%arg20 = %2#0, %arg21 = %2#1, %arg22 = %11) -> (vector<8x128xf32>, vector<8x128xf32>, vector<8x1xi32>)  : i32 {
      %14 = vector.broadcast %arg22 : vector<8x1xi32> to vector<8x128xi32>
      %15 = arith.cmpi eq, %7, %14 : vector<8x128xi32>
      %16 = arith.extui %15 : vector<8x128xi1> to vector<8x128xi32>
      %17 = arith.sitofp %16 : vector<8x128xi32> to vector<8x128xf32>
      %18 = arith.truncf %17 : vector<8x128xf32> to vector<8x128xbf16>
      %c0_13 = arith.constant 0 : index
      %c0_14 = arith.constant 0 : index
      %19 = vector.load %arg9[%c0_13, %c0_14] : memref<128x128xbf16, #tpu.memory_space<vmem>>, vector<128x128xbf16>
      %cst_15 = arith.constant dense<0.000000e+00> : vector<8x128xf32>
      %20 = tpu.matmul %18, %19, %cst_15 {dimension_numbers = #tpu.dot_dimension_numbers<[1], [0], [0], [1], [0, 0, 1, 1], [], []>} : vector<8x128xbf16>, vector<128x128xbf16>, vector<8x128xf32> -> vector<8x128xf32>
      %21 = arith.truncf %arg20 : vector<8x128xf32> to vector<8x128xbf16>
      %c0_16 = arith.constant 0 : index
      %c0_17 = arith.constant 0 : index
      %22 = vector.load %arg7[%c0_16, %c0_17] : memref<128x128xbf16, #tpu.memory_space<vmem>>, vector<128x128xbf16>
      %cst_18 = arith.constant dense<0.000000e+00> : vector<8x128xf32>
      %23 = tpu.matmul %21, %22, %cst_18 {dimension_numbers = #tpu.dot_dimension_numbers<[1], [0], [0], [1], [0, 0, 1, 1], [], []>} : vector<8x128xbf16>, vector<128x128xbf16>, vector<8x128xf32> -> vector<8x128xf32>
      %24 = vector.shape_cast %23 : vector<8x128xf32> to vector<1x8x128xf32>
      %c0_19 = arith.constant 0 : index
      %c0_20 = arith.constant 0 : index
      %c0_21 = arith.constant 0 : index
      %25 = vector.load %arg17[%c0_19, %c0_20, %c0_21] : memref<8x8x128xf32, #tpu.memory_space<vmem>>, vector<8x8x128xf32>
      %26 = vector.broadcast %24 : vector<1x8x128xf32> to vector<8x8x128xf32>
      %27 = arith.addf %26, %25 : vector<8x8x128xf32>
      %28 = math.tanh %27 : vector<8x8x128xf32>
      %29 = vector.shape_cast %28 : vector<8x8x128xf32> to vector<64x128xf32>
      %c0_22 = arith.constant 0 : index
      %c0_23 = arith.constant 0 : index
      %30 = vector.load %arg8[%c0_22, %c0_23] : memref<128x1xf32, #tpu.memory_space<vmem>>, vector<128x1xf32>
      %cst_24 = arith.constant dense<0.000000e+00> : vector<64x1xf32>
      %31 = tpu.matmul %29, %30, %cst_24 {dimension_numbers = #tpu.dot_dimension_numbers<[1], [0], [0], [1], [0, 0, 1, 1], [], []>} : vector<64x128xf32>, vector<128x1xf32>, vector<64x1xf32> -> vector<64x1xf32>
      %32 = vector.shape_cast %31 : vector<64x1xf32> to vector<8x8x1xf32>
      %cst_25 = arith.constant 0.000000e+00 : f32
      %33 = vector.broadcast %cst_25 : f32 to vector<8x8x1xf32>
      %34 = arith.cmpf ogt, %9, %33 : vector<8x8x1xf32>
      %cst_26 = arith.constant -1.000000e+10 : f32
      %35 = vector.broadcast %cst_26 : f32 to vector<8x8x1xf32>
      %36 = arith.select %34, %32, %35 : vector<8x8x1xi1>, vector<8x8x1xf32>
      %cst_27 = arith.constant dense<0xFF800000> : vector<8x1xf32>
      %37 = vector.multi_reduction <maximumf>, %36, %cst_27 [0] : vector<8x8x1xf32> to vector<8x1xf32>
      %38 = vector.shape_cast %37 : vector<8x1xf32> to vector<1x8x1xf32>
      %39 = vector.broadcast %38 : vector<1x8x1xf32> to vector<8x8x1xf32>
      %40 = arith.subf %36, %39 : vector<8x8x1xf32>
      %41 = math.exp %40 : vector<8x8x1xf32>
      %cst_28 = arith.constant dense<0.000000e+00> : vector<8x1xf32>
      %42 = vector.multi_reduction <add>, %41, %cst_28 [0] : vector<8x8x1xf32> to vector<8x1xf32>
      %43 = vector.shape_cast %42 : vector<8x1xf32> to vector<1x8x1xf32>
      %44 = vector.broadcast %43 : vector<1x8x1xf32> to vector<8x8x1xf32>
      %45 = arith.divf %41, %44 : vector<8x8x1xf32>
      %c0_29 = arith.constant 0 : index
      %c0_30 = arith.constant 0 : index
      %c0_31 = arith.constant 0 : index
      %46 = vector.load %arg16[%c0_29, %c0_30, %c0_31] : memref<8x8x128xf32, #tpu.memory_space<vmem>>, vector<8x8x128xf32>
      %47 = vector.broadcast %45 : vector<8x8x1xf32> to vector<8x8x128xf32>
      %48 = arith.mulf %47, %46 : vector<8x8x128xf32>
      %cst_32 = arith.constant dense<0.000000e+00> : vector<8x128xf32>
      %49 = vector.multi_reduction <add>, %48, %cst_32 [0] : vector<8x8x128xf32> to vector<8x128xf32>
      %50 = arith.truncf %20 : vector<8x128xf32> to vector<8x128xbf16>
      %c0_33 = arith.constant 0 : index
      %c0_34 = arith.constant 0 : index
      %51 = vector.load %arg18[%c0_33, %c0_34] : memref<8x384xbf16, #tpu.memory_space<vmem>>, vector<8x128xbf16>
      tpu.vector_store %arg18[%c0_33, %c0_34], %50 {strides = array<i32>} : memref<8x384xbf16, #tpu.memory_space<vmem>>, vector<8x128xbf16>,
      %52 = arith.truncf %49 : vector<8x128xf32> to vector<8x128xbf16>
      %c0_35 = arith.constant 0 : index
      %c128 = arith.constant 128 : index
      %53 = vector.load %arg18[%c0_35, %c128] : memref<8x384xbf16, #tpu.memory_space<vmem>>, vector<8x128xbf16>
      tpu.vector_store %arg18[%c0_35, %c128], %52 {strides = array<i32>} : memref<8x384xbf16, #tpu.memory_space<vmem>>, vector<8x128xbf16>,
      %54 = arith.truncf %arg20 : vector<8x128xf32> to vector<8x128xbf16>
      %c0_36 = arith.constant 0 : index
      %c256 = arith.constant 256 : index
      %55 = vector.load %arg18[%c0_36, %c256] : memref<8x384xbf16, #tpu.memory_space<vmem>>, vector<8x128xbf16>
      tpu.vector_store %arg18[%c0_36, %c256], %54 {strides = array<i32>} : memref<8x384xbf16, #tpu.memory_space<vmem>>, vector<8x128xbf16>,
      %c0_37 = arith.constant 0 : index
      %c0_38 = arith.constant 0 : index
      %56 = vector.load %arg18[%c0_37, %c0_38] : memref<8x384xbf16, #tpu.memory_space<vmem>>, vector<8x384xbf16>
      %c0_39 = arith.constant 0 : index
      %c0_40 = arith.constant 0 : index
      %57 = vector.load %arg11[%c0_39, %c0_40] : memref<384x512xbf16, #tpu.memory_space<vmem>>, vector<384x512xbf16>
      %cst_41 = arith.constant dense<0.000000e+00> : vector<8x512xf32>
      %58 = tpu.matmul %56, %57, %cst_41 {dimension_numbers = #tpu.dot_dimension_numbers<[1], [0], [0], [1], [0, 0, 1, 1], [], []>} : vector<8x384xbf16>, vector<384x512xbf16>, vector<8x512xf32> -> vector<8x512xf32>
      %c0_42 = arith.constant 0 : index
      %c0_43 = arith.constant 0 : index
      %59 = vector.load %arg12[%c0_42, %c0_43] : memref<1x512xf32, #tpu.memory_space<vmem>>, vector<1x512xf32>
      %60 = vector.broadcast %59 : vector<1x512xf32> to vector<8x512xf32>
      %61 = arith.addf %58, %60 : vector<8x512xf32>
      %62 = vector.extract_strided_slice %61 {offsets = [0, 0], sizes = [8, 128], strides = [1, 1]} : vector<8x512xf32> to vector<8x128xf32>
      %63 = arith.negf %62 : vector<8x128xf32>
      %64 = math.exp %63 : vector<8x128xf32>
      %cst_44 = arith.constant 1.000000e+00 : f32
      %65 = vector.broadcast %cst_44 : f32 to vector<8x128xf32>
      %66 = arith.addf %65, %64 : vector<8x128xf32>
      %67 = arith.divf %65, %66 : vector<8x128xf32>
      %68 = vector.extract_strided_slice %61 {offsets = [0, 128], sizes = [8, 128], strides = [1, 1]} : vector<8x512xf32> to vector<8x128xf32>
      %69 = arith.negf %68 : vector<8x128xf32>
      %70 = math.exp %69 : vector<8x128xf32>
      %cst_45 = arith.constant 1.000000e+00 : f32
      %71 = vector.broadcast %cst_45 : f32 to vector<8x128xf32>
      %72 = arith.addf %71, %70 : vector<8x128xf32>
      %73 = arith.divf %71, %72 : vector<8x128xf32>
      %74 = vector.extract_strided_slice %61 {offsets = [0, 256], sizes = [8, 128], strides = [1, 1]} : vector<8x512xf32> to vector<8x128xf32>
      %75 = math.tanh %74 : vector<8x128xf32>
      %76 = vector.extract_strided_slice %61 {offsets = [0, 384], sizes = [8, 128], strides = [1, 1]} : vector<8x512xf32> to vector<8x128xf32>
      %77 = arith.negf %76 : vector<8x128xf32>
      %78 = math.exp %77 : vector<8x128xf32>
      %cst_46 = arith.constant 1.000000e+00 : f32
      %79 = vector.broadcast %cst_46 : f32 to vector<8x128xf32>
      %80 = arith.addf %79, %78 : vector<8x128xf32>
      %81 = arith.divf %79, %80 : vector<8x128xf32>
      %82 = arith.mulf %73, %arg21 : vector<8x128xf32>
      %83 = arith.mulf %67, %75 : vector<8x128xf32>
      %84 = arith.addf %82, %83 : vector<8x128xf32>
      %85 = math.tanh %84 : vector<8x128xf32>
      %86 = arith.mulf %81, %85 : vector<8x128xf32>
      %87 = arith.truncf %86 : vector<8x128xf32> to vector<8x128xbf16>
      %c0_47 = arith.constant 0 : index
      %c256_48 = arith.constant 256 : index
      %88 = vector.load %arg18[%c0_47, %c256_48] : memref<8x384xbf16, #tpu.memory_space<vmem>>, vector<8x128xbf16>
      tpu.vector_store %arg18[%c0_47, %c256_48], %87 {strides = array<i32>} : memref<8x384xbf16, #tpu.memory_space<vmem>>, vector<8x128xbf16>,
      %c0_49 = arith.constant 0 : index
      %c0_50 = arith.constant 0 : index
      %89 = vector.load %arg18[%c0_49, %c0_50] : memref<8x384xbf16, #tpu.memory_space<vmem>>, vector<8x384xbf16>
      %c0_51 = arith.constant 0 : index
      %c0_52 = arith.constant 0 : index
      %90 = vector.load %arg13[%c0_51, %c0_52] : memref<384x128xbf16, #tpu.memory_space<vmem>>, vector<384x128xbf16>
      %cst_53 = arith.constant dense<0.000000e+00> : vector<8x128xf32>
      %91 = tpu.matmul %89, %90, %cst_53 {dimension_numbers = #tpu.dot_dimension_numbers<[1], [0], [0], [1], [0, 0, 1, 1], [], []>} : vector<8x384xbf16>, vector<384x128xbf16>, vector<8x128xf32> -> vector<8x128xf32>
      %c0_54 = arith.constant 0 : index
      %c0_55 = arith.constant 0 : index
      %92 = vector.load %arg14[%c0_54, %c0_55] : memref<1x128xf32, #tpu.memory_space<vmem>>, vector<1x128xf32>
      %93 = vector.broadcast %92 : vector<1x128xf32> to vector<8x128xf32>
      %94 = arith.addf %91, %93 : vector<8x128xf32>
      %c1_i32_56 = arith.constant 1 : i32
      %95 = arith.addi %arg19, %c1_i32_56 : i32
      %96 = arith.index_cast %95 : i32 to index
      %c0_57 = arith.constant 0 : index
      %c0_58 = arith.constant 0 : index
      %97 = vector.load %arg15[%96, %c0_57, %c0_58] : memref<8x8x128xf32, #tpu.memory_space<vmem>>, vector<1x8x128xf32>
      %98 = vector.shape_cast %97 : vector<1x8x128xf32> to vector<8x128xf32>
      %99 = vector.shape_cast %94 : vector<8x128xf32> to vector<1x8x128xf32>
      tpu.vector_store %arg15[%96, %c0_57, %c0_58], %99 {strides = array<i32>} : memref<8x8x128xf32, #tpu.memory_space<vmem>>, vector<1x8x128xf32>,
      %cst_59 = arith.constant dense<0xFF800000> : vector<8xf32>
      %100 = vector.multi_reduction <maximumf>, %94, %cst_59 [1] : vector<8x128xf32> to vector<8xf32>
      %101 = vector.shape_cast %100 : vector<8xf32> to vector<8x1xf32>
      %102 = vector.broadcast %101 : vector<8x1xf32> to vector<8x128xf32>
      %103 = arith.cmpf oge, %94, %102 : vector<8x128xf32>
      %cst_60 = arith.constant 1.280000e+02 : f32
      %104 = vector.broadcast %cst_60 : f32 to vector<8x128xf32>
      %105 = arith.select %103, %8, %104 : vector<8x128xi1>, vector<8x128xf32>
      %cst_61 = arith.constant dense<0x7F800000> : vector<8xf32>
      %106 = vector.multi_reduction <minimumf>, %105, %cst_61 [1] : vector<8x128xf32> to vector<8xf32>
      %107 = vector.shape_cast %106 : vector<8xf32> to vector<8x1xf32>
      %108 = arith.fptosi %107 : vector<8x1xf32> to vector<8x1xi32>
      %109 = arith.index_cast %arg19 : i32 to index
      %110 = memref.load %arg0[%109] : memref<7xi32, #tpu.memory_space<smem>>
      %c0_i32_62 = arith.constant 0 : i32
      %111 = arith.cmpi sgt, %110, %c0_i32_62 : i32
      %c1_i32_63 = arith.constant 1 : i32
      %112 = arith.addi %arg19, %c1_i32_63 : i32
      %113 = arith.index_cast %112 : i32 to index
      %c0_64 = arith.constant 0 : index
      %c0_65 = arith.constant 0 : index
      %114 = vector.load %arg10[%113, %c0_64, %c0_65] : memref<8x8x1xi32, #tpu.memory_space<vmem>>, vector<1x8x1xi32>
      %115 = vector.shape_cast %114 : vector<1x8x1xi32> to vector<8x1xi32>
      %116 = arith.select %111, %115, %108 : vector<8x1xi32>
      scf.yield %86, %84, %116 : vector<8x128xf32>, vector<8x128xf32>, vector<8x1xi32>
    }
    %c7_i32_12 = arith.constant 7 : i32
    return
  }
}

</mosaic_0001>

<bundles_post_ra>
// kernel: _forward_impl.1
= control target key start
LH: loop header
LB: loop body
LE: loop exit
PB: predicated region body
PF: predicated region fallthrough
CT: control target
= control target key end

     0   :  { %20 = vsyncpa [#allocation6], 0  ;;  %s4391_s0 = inlined_call_operand.vmem [shape: s32[7], index: 0, kind: input, shape index: {}]   ;;  %s4392_s1 = inlined_call_operand.vmem [shape: bf16[8,8,128], index: 1, kind: input, shape index: {}]   ;;  %s4393_s2 = inlined_call_operand.vmem [shape: f32[8,8,1], index: 2, kind: input, shape index: {}]   ;;  %s4394_s3 = inlined_call_operand.vmem [shape: bf16[256,512], index: 3, kind: input, shape index: {}]   ;;  %s4395_s4 = inlined_call_operand.vmem [shape: f32[1,512], index: 4, kind: input, shape index: {}]   ;;  %s4396_s5 = inlined_call_operand.vmem [shape: bf16[128,128], index: 5, kind: input, shape index: {}]   ;;  %s4397_s6 = inlined_call_operand.vmem [shape: f32[1,128], index: 6, kind: input, shape index: {}]   ;;  %s4398_s7 = inlined_call_operand.vmem [shape: bf16[128,128], index: 7, kind: input, shape index: {}]   ;;  %s4399_s8 = inlined_call_operand.vmem [shape: f32[128,1], index: 8, kind: input, shape index: {}]   ;;  %s4400_s9 = inlined_call_operand.vmem [shape: bf16[128,128], index: 9, kind: input, shape index: {}]   ;;  %s4401_s10 = inlined_call_operand.vmem [shape: s32[8,8,1], index: 10, kind: input, shape index: {}]   ;;  %s4402_s11 = inlined_call_operand.vmem [shape: bf16[384,512], index: 11, kind: input, shape index: {}]   ;;  %s4403_s12 = inlined_call_operand.vmem [shape: f32[1,512], index: 12, kind: input, shape index: {}]   ;;  %s4404_s13 = inlined_call_operand.vmem [shape: bf16[384,128], index: 13, kind: input, shape index: {}]   ;;  %s4405_s14 = inlined_call_operand.vmem [shape: f32[1,128], index: 14, kind: input, shape index: {}]   ;;  %s4406_s15 = inlined_call_operand.vmem [shape: f32[8,8,128], index: 15, kind: output, shape index: {}]  }
   0x1   :  { %s27_s20 = sshll.u32 %s4391_s0, 4  ;;  %s28_s20 = int_to_ptr.vmem [resolvable:$true] %s27_s20 }
   0x2   :  { %s3328_s21 = scalar_lea.vmem %s28_s20, 16  ;;  %p3333_p1 = scmp.lt.s32.totalorder %s28_s20, %s28_s20 }
   0x3   :  { %p3329_p0 = scmp.ne.s32.totalorder %s28_s20, %s3328_s21  ;;  %p3334_p2 = scmp.lt.s32.totalorder %s3328_s21, %s3328_s21 }
   0x5   :  { %p3335_p3 = por %p3334_p2, %p3333_p1 }
   0x7   :  { %p3336_p4 = pnand %p3335_p3, %p3329_p0 }
   0x9   :  { %3339 = shalt.err (!%p3336_p4)
}
   0xa   :  { %s3398_s22 = smov [#allocation5]  }
   0xb   :  { %30 = dma.vmem_to_smem %s28_s20, 16, %s3398_s22, [#allocation6]  }
   0xc   :  { %3368 = dma.done.wait [#allocation6], 16  }
   0xd   :  { %3369 = vsyncadd [#allocation6], 4294967280 }
   0xe   :  { %62 = sfence }
   0xf   :  { %v3490_v0 = vmov 0.0   ;;  %v3492_v1 = vmov 0.0   ;;  %s3494_s23 = smov 0  }
  0x10 LB: > { %v2966_v2 = vld [vmem:[%s4394_s3 + $0x4] ss:$16 sps:$4 sm:$0xff]   ;;  %v2968_v3 = vld [vmem:[%s4394_s3] ss:$16 sps:$4 sm:$0xff]   ;;  %v3399_v4 = vmov 0   ;;  %v76_v6 = vpack.c.bf16 %v3376_v1, %v3376_v1  ;;  %s2410_s18 = sshll.u32 %s3380_s23, 2  ;;  %s3380_s23 = sphi %s3494_s23, %s69_s23   ;;  %v3376_v1 = vphi %v3492_v1, %v4408_v1   ;;  %v3372_v0 = vphi %v3490_v0, %v4407_v0  }
  0x11   : > { %2965 = vset.pattern.permute.xlu0 %v3399_v4  ;;  %492 = vmatprep.subr.bf16.mxu0 %v2966_v2  ;;  %v2969_v5 = vld [vmem:[%s4394_s3 + $0x24] ss:$16 sps:$4 sm:$0xff]   ;;  %v2971_v7 = vld [vmem:[%s4394_s3 + $0x20] ss:$16 sps:$4 sm:$0xff]   ;;  %v2977_v9 = vld [vmem:[%s4394_s3 + $0xc] ss:$16 sps:$4 sm:$0xff]   ;;  %s73_s27 = scalar_lea.vmem %s4392_s1, %s2410_s18 }
  0x12   : > { %493 = vmatpush1.bf16.msra.mxu0 %v2968_v3  ;;  %v2972_v8 = vld [vmem:[%s4394_s3 + $0x44] ss:$16 sps:$4 sm:$0xff]   ;;  %77 = vst [vmem:[#allocation4 + $0x4] sm:$0xf] %v76_v6  ;;  %v2980_v10 = vld [vmem:[%s4394_s3 + $0x8] ss:$16 sps:$4 sm:$0xff]   ;;  %533 = vmatprep.subr.bf16.mxu1 %v2977_v9 }
  0x13   : > { %494 = vmatprep.subr.bf16.mxu0 %v2969_v5  ;;  %v2974_v11 = vld [vmem:[%s4394_s3 + $0x40] ss:$16 sps:$4 sm:$0xff]   ;;  %v2975_v12 = vld [vmem:[%s4394_s3 + $0x64] ss:$16 sps:$4 sm:$0xff]   ;;  %534 = vmatpush1.bf16.msra.mxu1 %v2980_v10  ;;  %v2983_v13 = vld [vmem:[%s4394_s3 + $0x2c] ss:$16 sps:$4 sm:$0xff]  }
  0x14   : > { %v2986_v14 = vld [vmem:[%s4394_s3 + $0x28] ss:$16 sps:$4 sm:$0xff]   ;;  %535 = vmatprep.subr.bf16.mxu1 %v2983_v13  ;;  %v2979_v15 = vld [vmem:[%s4394_s3 + $0x60] ss:$16 sps:$4 sm:$0xff]   ;;  %v2981_v16 = vld [vmem:[%s4394_s3 + $0x84] ss:$16 sps:$4 sm:$0xff]  }
  0x15   : > { %v2989_v17 = vld [vmem:[%s4394_s3 + $0x4c] ss:$16 sps:$4 sm:$0xff]   ;;  %v2992_v18 = vld [vmem:[%s4394_s3 + $0x48] ss:$16 sps:$4 sm:$0xff]   ;;  %v2985_v20 = vld [vmem:[%s4394_s3 + $0x80] ss:$16 sps:$4 sm:$0xff]  }
  0x16   : > { %495 = vmatpush1.bf16.msra.mxu0 %v2971_v7  ;;  %v2995_v19 = vld [vmem:[%s4394_s3 + $0x6c] ss:$16 sps:$4 sm:$0xff]   ;;  %v2987_v21 = vld [vmem:[%s4394_s3 + $0xa4] ss:$16 sps:$4 sm:$0xff]   ;;  %v2998_v22 = vld [vmem:[%s4394_s3 + $0x68] ss:$16 sps:$4 sm:$0xff]  }
  0x17   : > { %496 = vmatprep.subr.bf16.mxu0 %v2972_v8  ;;  %536 = vmatpush1.bf16.msra.mxu1 %v2986_v14  ;;  %v3001_v23 = vld [vmem:[%s4394_s3 + $0x8c] ss:$16 sps:$4 sm:$0xff]   ;;  %v2991_v24 = vld [vmem:[%s4394_s3 + $0xa0] ss:$16 sps:$4 sm:$0xff]   ;;  %v2993_v25 = vld [vmem:[%s4394_s3 + $0xc4] ss:$16 sps:$4 sm:$0xff]  }
  0x18   : > { %537 = vmatprep.subr.bf16.mxu1 %v2989_v17  ;;  %v3004_v26 = vld [vmem:[%s4394_s3 + $0x88] ss:$16 sps:$4 sm:$0xff]   ;;  %v3007_v27 = vld [vmem:[%s4394_s3 + $0xac] ss:$16 sps:$4 sm:$0xff]   ;;  %v2997_v28 = vld [vmem:[%s4394_s3 + $0xc0] ss:$16 sps:$4 sm:$0xff]  }
  0x19   : > { %v2999_v29 = vld [vmem:[%s4394_s3 + $0xe4] ss:$16 sps:$4 sm:$0xff]   ;;  %v3010_v30 = vld [vmem:[%s4394_s3 + $0xa8] ss:$16 sps:$4 sm:$0xff]   ;;  %v3013_v31 = vld [vmem:[%s4394_s3 + $0xcc] ss:$16 sps:$4 sm:$0xff]  }
  0x1a   : > { %497 = vmatpush1.bf16.msra.mxu0 %v2974_v11  ;;  %v3003_v32 = vld [vmem:[%s4394_s3 + $0xe0] ss:$16 sps:$4 sm:$0xff]   ;;  %v3005_v33 = vld [vmem:[%s4394_s3 + $0x104] ss:$16 sps:$4 sm:$0xff]   ;;  %v3016_v34 = vld [vmem:[%s4394_s3 + $0xc8] ss:$16 sps:$4 sm:$0xff]  }
  0x1b   : > { %498 = vmatprep.subr.bf16.mxu0 %v2975_v12  ;;  %538 = vmatpush1.bf16.msra.mxu1 %v2992_v18  ;;  %v3019_v35 = vld [vmem:[%s4394_s3 + $0xec] ss:$16 sps:$4 sm:$0xff]   ;;  %v3009_v36 = vld [vmem:[%s4394_s3 + $0x100] ss:$16 sps:$4 sm:$0xff]   ;;  %v3011_v37 = vld [vmem:[%s4394_s3 + $0x124] ss:$16 sps:$4 sm:$0xff]  }
  0x1c   : > { %539 = vmatprep.subr.bf16.mxu1 %v2995_v19  ;;  %v3022_v38 = vld [vmem:[%s4394_s3 + $0xe8] ss:$16 sps:$4 sm:$0xff]   ;;  %v3025_v39 = vld [vmem:[%s4394_s3 + $0x10c] ss:$16 sps:$4 sm:$0xff]   ;;  %v3015_v40 = vld [vmem:[%s4394_s3 + $0x120] ss:$16 sps:$4 sm:$0xff]   ;;  %v145_v19 = vlaneseq }
  0x1d   : > { %v3017_v41 = vld [vmem:[%s4394_s3 + $0x144] ss:$16 sps:$4 sm:$0xff]   ;;  %v3028_v42 = vld [vmem:[%s4394_s3 + $0x108] ss:$16 sps:$4 sm:$0xff]   ;;  %v3031_v43 = vld [vmem:[%s4394_s3 + $0x12c] ss:$16 sps:$4 sm:$0xff]  }
  0x1e   : > { %499 = vmatpush1.bf16.msra.mxu0 %v2979_v15  ;;  %s3628_s17 = sshll.u32 %s3380_s23, 3  ;;  %v3021_v44 = vld [vmem:[%s4394_s3 + $0x140] ss:$16 sps:$4 sm:$0xff]   ;;  %v3023_v46 = vld [vmem:[%s4394_s3 + $0x164] ss:$16 sps:$4 sm:$0xff]   ;;  %v3400_v11 = vmov 0.0  }
  0x1f   : > { %500 = vmatprep.subr.bf16.mxu0 %v2981_v16  ;;  %540 = vmatpush1.bf16.msra.mxu1 %v2998_v22  ;;  %v74_v45 = vld [vmem:[%s73_s27] sm:$0xf]  ;;  %v3034_v47 = vld [vmem:[%s4394_s3 + $0x128] ss:$16 sps:$4 sm:$0xff]   ;;  %s599_s26 = scalar_lea.vmem %s4393_s2, %s3628_s17  ;;  %v3037_v49 = vld [vmem:[%s4394_s3 + $0x14c] ss:$16 sps:$4 sm:$0xff]  }
  0x20   : > { %541 = vmatprep.subr.bf16.mxu1 %v3001_v23  ;;  %75 = vst [vmem:[#allocation4] sm:$0xf] %v74_v45  ;;  %v3027_v48 = vld [vmem:[%s4394_s3 + $0x160] ss:$16 sps:$4 sm:$0xff]   ;;  %v3029_v50 = vld [vmem:[%s4394_s3 + $0x184] ss:$16 sps:$4 sm:$0xff]  }
  0x21   : > { %v3040_v51 = vld [vmem:[%s4394_s3 + $0x148] ss:$16 sps:$4 sm:$0xff]   ;;  %v3043_v52 = vld [vmem:[%s4394_s3 + $0x16c] ss:$16 sps:$4 sm:$0xff]   ;;  %v600_v53 = vld [vmem:[%s599_s26] sm:$0xff]  ;;  %vm3401_vm0 = vmmov 0  }
  0x22   : > { %501 = vmatpush1.bf16.msra.mxu0 %v2985_v20  ;;  %v3033_v54 = vld [vmem:[%s4394_s3 + $0x180] ss:$16 sps:$4 sm:$0xff]   ;;  %603 = vperm.xlu0 %2965, %v600_v53   ;;  %v3035_v55 = vld [vmem:[%s4394_s3 + $0x1a4] ss:$16 sps:$4 sm:$0xff]   ;;  %v3046_v56 = vld [vmem:[%s4394_s3 + $0x168] ss:$16 sps:$4 sm:$0xff]  }
  0x23   : > { %502 = vmatprep.subr.bf16.mxu0 %v2987_v21  ;;  %542 = vmatpush1.bf16.msra.mxu1 %v3004_v26  ;;  %v3049_v59 = vld [vmem:[%s4394_s3 + $0x18c] ss:$16 sps:$4 sm:$0xff]   ;;  %v3039_v60 = vld [vmem:[%s4394_s3 + $0x1a0] ss:$16 sps:$4 sm:$0xff]   ;;  %v3041_v61 = vld [vmem:[%s4394_s3 + $0x1c4] ss:$16 sps:$4 sm:$0xff]  }
  0x24   : > { %543 = vmatprep.subr.bf16.mxu1 %v3007_v27  ;;  %v3052_v62 = vld [vmem:[%s4394_s3 + $0x188] ss:$16 sps:$4 sm:$0xff]   ;;  %v3055_v63 = vld [vmem:[%s4394_s3 + $0x1ac] ss:$16 sps:$4 sm:$0xff]   ;;  %v3045_v1 = vld [vmem:[%s4394_s3 + $0x1c0] ss:$16 sps:$4 sm:$0xff]  }
  0x25   : > { %v3047_v2 = vld [vmem:[%s4394_s3 + $0x1e4] ss:$16 sps:$4 sm:$0xff]   ;;  %v3057_v3 = vld [vmem:[%s4394_s3 + $0x1a8] ss:$16 sps:$4 sm:$0xff]   ;;  %v3058_v4 = vld [vmem:[%s4394_s3 + $0x1cc] ss:$16 sps:$4 sm:$0xff]  }
  0x26   : > { %503 = vmatpush1.bf16.msra.mxu0 %v2991_v24  ;;  %v3051_v5 = vld [vmem:[%s4394_s3 + $0x1e0] ss:$16 sps:$4 sm:$0xff]   ;;  %v3060_v6 = vld [vmem:[%s4394_s3 + $0x1c8] ss:$16 sps:$4 sm:$0xff]   ;;  %v3061_v7 = vld [vmem:[%s4394_s3 + $0x1ec] ss:$16 sps:$4 sm:$0xff]  }
  0x27   : > { %504 = vmatprep.subr.bf16.mxu0 %v2993_v25  ;;  %544 = vmatpush1.bf16.msra.mxu1 %v3010_v30  ;;  %v78_v57 = vld [vmem:[#allocation4] sm:$0xff]  ;;  %v3063_v9 = vld [vmem:[%s4394_s3 + $0x1e8] ss:$16 sps:$4 sm:$0xff]   ;;  %v3066_v13 = vld [vmem:[%s4396_s5 + $0x10] sm:$0xff]   ;;  %v3731_v20 = vshrl.u32 %v145_v19, 7  ;;  %s607_s16 = scalar_lea.vmem [#allocation2], %s3628_s17 }
  0x28   : > { %545 = vmatprep.subr.bf16.mxu1 %v3013_v31  ;;  %v2412_v58 = vcombine.high %v78_v57, %v78_v57  ;;  %v2411_v8 = vcombine.low %v78_v57, %v78_v57  ;;  %v3064_v10 = vld [vmem:[%s4396_s5] sm:$0xff]   ;;  %v3065_v12 = vld [vmem:[%s4396_s5 + $0x8] sm:$0xff]   ;;  %v3067_v14 = vld [vmem:[%s4396_s5 + $0x18] sm:$0xff]   ;;  %s721_s18 = scalar_lea.vmem [#allocation3], %s3628_s17  ;;  %s69_s23 = sadd.s32 1, %s3380_s23  }
  0x29   : > { %v3068_v15 = vld [vmem:[%s4396_s5 + $0x20] sm:$0xff]   ;;  %v3069_v16 = vld [vmem:[%s4396_s5 + $0x28] sm:$0xff]   ;;  %v3070_v17 = vld [vmem:[%s4396_s5 + $0x30] sm:$0xff]   ;;  %v147_v21 = vsub.s32 0, %v3731_v20  ;;  %v151_v23 = vsub.s32 1, %v3731_v20  ;;  %v159_v26 = vsub.s32 3, %v3731_v20 }
  0x2a   : > { %505 = vmatpush1.bf16.msra.mxu0 %v2997_v28  ;;  %524 = vmatprep.mubr.bf16.mxu0 %v2412_v58  ;;  %v3071_v18 = vld [vmem:[%s4396_s5 + $0x38] sm:$0xff]   ;;  %v143_v22 = vld [vmem:[%s4395_s4] sm:$0xf]  ;;  %p66_p5 = scmp.ge.s32.totalorder %s69_s23, 8  }
  0x2b   : > { %506 = vmatprep.subr.bf16.mxu0 %v2999_v29  ;;  %546 = vmatpush1.bf16.msra.mxu1 %v3016_v34  ;;  %v148_v24 = vrot.slane %v143_v22, %v147_v21  ;;  %v152_v25 = vrot.slane %v143_v22, %v151_v23  ;;  %v160_v34 = vrot.slane %v143_v22, %v159_v26 }
  0x2c   : > { %547 = vmatprep.subr.bf16.mxu1 %v3019_v35  ;;  %565 = vmatprep.mubr.bf16.mxu1 %v2412_v58 }
  0x2e   : > { %507 = vmatpush1.bf16.msra.mxu0 %v3003_v32 }
  0x2f   : > { %508 = vmatprep.subr.bf16.mxu0 %v3005_v33  ;;  %548 = vmatpush1.bf16.msra.mxu1 %v3022_v38 }
  0x30   : > { %549 = vmatprep.subr.bf16.mxu1 %v3025_v39 }
  0x32   : > { %509 = vmatpush1.bf16.msra.mxu0 %v3009_v36  ;;  %v155_v36 = vsub.s32 2, %v3731_v20 }
  0x33   : > { %510 = vmatprep.subr.bf16.mxu0 %v3011_v37  ;;  %550 = vmatpush1.bf16.msra.mxu1 %v3028_v42 }
  0x34   : > { %551 = vmatprep.subr.bf16.mxu1 %v3031_v43 }
  0x36   : > { %511 = vmatpush1.bf16.msra.mxu0 %v3015_v40 }
  0x37   : > { %512 = vmatprep.subr.bf16.mxu0 %v3017_v41  ;;  %552 = vmatpush1.bf16.msra.mxu1 %v3034_v47  ;;  %v156_v41 = vrot.slane %v143_v22, %v155_v36 }
  0x38   : > { %553 = vmatprep.subr.bf16.mxu1 %v3037_v49 }
  0x3a   : > { %513 = vmatpush1.bf16.msra.mxu0 %v3021_v44 }
  0x3b   : > { %514 = vmatprep.subr.bf16.mxu0 %v3023_v46  ;;  %554 = vmatpush1.bf16.msra.mxu1 %v3040_v51 }
  0x3c   : > { %555 = vmatprep.subr.bf16.mxu1 %v3043_v52 }
  0x3e   : > { %515 = vmatpush1.bf16.msra.mxu0 %v3027_v48 }
  0x3f   : > { %516 = vmatprep.subr.bf16.mxu0 %v3029_v50  ;;  %556 = vmatpush1.bf16.msra.mxu1 %v3046_v56 }
  0x40   : > { %557 = vmatprep.subr.bf16.mxu1 %v3049_v59 }
  0x42   : > { %517 = vmatpush1.bf16.msra.mxu0 %v3033_v54 }
  0x43   : > { %518 = vmatprep.subr.bf16.mxu0 %v3035_v55  ;;  %558 = vmatpush1.bf16.msra.mxu1 %v3052_v62 }
  0x44   : > { %559 = vmatprep.subr.bf16.mxu1 %v3055_v63  ;;  %v2481_v63 = vld [vmem:[%s4397_s6] ss:$0 sm:$0xff] }
  0x46   : > { %519 = vmatpush1.bf16.msra.mxu0 %v3039_v60 }
  0x47   : > { %520 = vmatprep.subr.bf16.mxu0 %v3041_v61  ;;  %560 = vmatpush1.bf16.msra.mxu1 %v3057_v3 }
  0x48   : > { %561 = vmatprep.subr.bf16.mxu1 %v3058_v4 }
  0x4a   : > { %521 = vmatpush1.bf16.msra.mxu0 %v3045_v1 }
  0x4b   : > { %522 = vmatprep.subr.bf16.mxu0 %v3047_v2  ;;  %562 = vmatpush1.bf16.msra.mxu1 %v3060_v6  ;;  %v3767_v6 = vld [vmem:[%s4393_s2] sm:$0xff] (%p66_p5) }
  0x4c   : > { %563 = vmatprep.subr.bf16.mxu1 %v3061_v7  ;;  %v3772_v7 = vld [vmem:[%s4393_s2 + $0x8] sm:$0xff] (%p66_p5) }
  0x4e   : > { %523 = vmatpush1.bf16.msra.mxu0 %v3051_v5  ;;  %v3762_v5 = vand.u32 (%p66_p5), 127, %v145_v19 }
  0x4f   : > { %564 = vmatpush1.bf16.msra.mxu1 %v3063_v9  ;;  %2730 = vmatprep.subr.bf16.mxu0 %v3400_v11  ;;  %v3402_v9 = vmov (%p66_p5), 0.0  }
  0x50   :  { %723 = vst [vmem:[%s4406_s15] sm:$0xff] (%p66_p5), %v3402_v9 }
  0x51   : > { %525 = vmatmul.mubr.bf16.vlgmr.msra.gmra.mrb[0].mxu0 %v2411_v8 }
  0x52   : > { %566 = vmatmul.mubr.bf16.vlgmr.msra.gmra.mrb[0].mxu1 %v2411_v8  ;;  %2731 = vmatpush3.bf16.msra.mxu0 %v3064_v10  ;;  %v3777_v8 = vld [vmem:[%s4393_s2 + $0x10] sm:$0xff] (%p66_p5)  ;;  %v3785_v10 = vld [vmem:[%s4393_s2 + $0x18] sm:$0xff] (%p66_p5) }
  0x53   : > { %2732 = vmatprep.subr.bf16.mxu0 %v3400_v11  ;;  %2746 = vmatprep.mubr.msk.bf16.mxu0 %vm3401_vm0, %v3400_v11 }
  0x56   : > { %2733 = vmatpush3.bf16.msra.mxu0 %v3065_v12  ;;  %v3795_v12 = vld [vmem:[%s4393_s2 + $0x28] sm:$0xff] (%p66_p5) }
  0x57   : > { %2734 = vmatprep.subr.bf16.mxu0 %v3400_v11 }
  0x5a   : > { %2735 = vmatpush3.bf16.msra.mxu0 %v3066_v13  ;;  %v726_v13 = vcvt.s32.f32 (%p66_p5), %v3762_v5 }
  0x5b   : > { %2736 = vmatprep.subr.bf16.mxu0 %v3400_v11 }
  0x5e   : > { %2737 = vmatpush3.bf16.msra.mxu0 %v3067_v14  ;;  %v3801_v14 = vld [vmem:[%s4393_s2 + $0x30] sm:$0xff] (%p66_p5) }
  0x5f   : > { %2738 = vmatprep.subr.bf16.mxu0 %v3400_v11 }
  0x62   : > { %2739 = vmatpush3.bf16.msra.mxu0 %v3068_v15  ;;  %v3806_v15 = vld [vmem:[%s4393_s2 + $0x38] sm:$0xff] (%p66_p5) }
  0x63   : > { %2740 = vmatprep.subr.bf16.mxu0 %v3400_v11 }
  0x66   : > { %2741 = vmatpush3.bf16.msra.mxu0 %v3069_v16  ;;  %v735_v16 = vld [vmem:[%s4401_s10] sm:$0xff] (%p66_p5)  }
  0x67   : > { %2742 = vmatprep.subr.bf16.mxu0 %v3400_v11 }
  0x6a   : > { %2743 = vmatpush3.bf16.msra.mxu0 %v3070_v17 }
  0x6b   : > { %2744 = vmatprep.subr.bf16.mxu0 %v3400_v11  ;;  %v3790_v11 = vld [vmem:[%s4393_s2 + $0x20] sm:$0xff] (%p66_p5) }
  0x6e   : > { %2745 = vmatpush3.bf16.msra.mxu0 %v3071_v18 }
  0xa1   : > { %v604_v59 = vpop.permute.xlu0 %603 }
 0x124   : > { %v526_v27 = vpop.f32.mrb[0].mxu0 }
 0x125   : > { %v527_v28 = vadd.f32 %v526_v27, %v148_v24  ;;  %v528_v29 = vpop.f32.mrb[1].mxu0  ;;  %v567_v37 = vpop.f32.mrb[0].mxu1 }
 0x126   : > { %v529_v30 = vadd.f32 %v528_v29, %v152_v25  ;;  %v530_v31 = vpop.f32.mrb[2].mxu0  ;;  %v569_v38 = vpop.f32.mrb[1].mxu1  ;;  %v568_v44 = vadd.f32 %v567_v37, %v156_v41 }
 0x127   : > { %v2477_v32 = vmul.f32 -1.442695, %v527_v28  ;;  %v531_v33 = vpop.f32.mrb[3].mxu0  ;;  %v570_v39 = vadd.f32 %v569_v38, %v160_v34  ;;  %v571_v40 = vpop.f32.mrb[2].mxu1 }
 0x128   : > { %v2478_v35 = vmul.f32 -1.442695, %v529_v30  ;;  %v572_v42 = vpop.f32.mrb[3].mxu1 }
 0x129   : > { %3072 = vpow2.f32 %v2477_v32  ;;  %v2479_v43 = vmul.f32 -1.442695, %v570_v39 }
 0x12a   : > { %3074 = vpow2.f32 %v2478_v35 }
 0x12b   : > { %3076 = vpow2.f32 %v2479_v43 }
 0x12c   : > { %3078 = vtanh.f32 %v568_v44 }
 0x133   : > { %v3073_v45 = vpop.eup %3072 }
 0x134   : > { %v3075_v46 = vpop.eup %3074  ;;  %v577_v47 = vadd.f32 1.0, %v3073_v45 }
 0x135   : > { %v583_v48 = vadd.f32 1.0, %v3075_v46  ;;  %v3077_v49 = vpop.eup %3076 }
 0x136   : > { %3080 = vrcp.f32 %v577_v47  ;;  %v3079_v50 = vpop.eup %3078  ;;  %v590_v52 = vadd.f32 1.0, %v3077_v49 }
 0x137   : > { %3082 = vrcp.f32 %v583_v48 }
 0x138   : > { %3084 = vrcp.f32 %v590_v52 }
 0x140   : > { %v3081_v51 = vpop.eup %3080 }
 0x141   : > { %v3083_v53 = vpop.eup %3082  ;;  %v594_v54 = vmul.f32 %v3081_v51, %v3079_v50 }
 0x142   : > { %v593_v55 = vmul.f32 %v3372_v0, %v3083_v53  ;;  %v3085_v57 = vpop.eup %3084 }
 0x144   : > { %v595_v56 = vadd.f32 %v594_v54, %v593_v55  }
 0x146   : > { %3086 = vtanh.f32 %v595_v56 }
 0x150   : > { %v3087_v58 = vpop.eup %3086 }
 0x151   : > { %v597_v60 = vmul.f32 %v3087_v58, %v3085_v57  }
 0x153   : > { %v606_v61 = vmul.f32 %v604_v59, %v597_v60 }
 0x155   : > { %608 = vst [vmem:[%s607_s16] sm:$0xff] %v606_v61  ;;  %v609_v62 = vpack.c.bf16 %v606_v61, %v606_v61 }
 0x157   : > { %2747 = vmatmul.mubr.bf16.vlgmr.msra.gmra.mrb[4].mxu0 %v609_v62 }
 0x227   :  { %68 = sbr.rel (!%p66_p5) target bundleno = 16 (0x10), region = 104 }
 0x22a   : > { %v715_v1 = vpop.f32.mrb[4].mxu0 }
 0x22b   : > { %v716_v2 = vadd.f32 %v2481_v63, %v715_v1  ;;  %v2748_v0 = vpop.f32.mrb[5].mxu0  ;;  %v4408_v1 = vmov %v597_v60 }
 0x22c   : > { %v718_v3 = vpop.f32.mrb[6].mxu0  ;;  %v4407_v0 = vmov %v595_v56 }
 0x22d   : > { %722 = vst [vmem:[%s721_s18] sm:$0xff] %v716_v2  ;;  %v2749_v4 = vpop.f32.mrb[7].mxu0  ;;  %s3817_s18 = smov (%p66_p5), 0  }
 0x22e LB: > { %v3090_v17 = vld [vmem:[%s4398_s7] sm:$0xff]   ;;  %v3403_v18 = vmov 0.0   ;;  %v3091_v19 = vld [vmem:[%s4398_s7 + $0x8] sm:$0xff]   ;;  %vm3404_vm1 = vmmov 0   ;;  %v856_v22 = vpack.c.bf16 %v3392_v60, %v3392_v60  ;;  %v3405_v24 = vmov 0   ;;  %v3092_v25 = vld [vmem:[%s4398_s7 + $0x10] sm:$0xff]   ;;  %s3396_s18 = sphi %s3817_s18, %s741_s18   ;;  %v3392_v60 = vphi %v597_v60, %v2052_v60   ;;  %v3388_v56 = vphi %v595_v56, %v2050_v56   ;;  %v3384_v16 = vphi %v735_v16, %v2365_v16  }
 0x22f   : > { %2770 = vmatprep.subr.bf16.mxu1 %v3403_v18  ;;  %2750 = vmatprep.subr.bf16.mxu0 %v3403_v18  ;;  %v3098_v27 = vld [vmem:[%s4400_s9] sm:$0xff]   ;;  %v3093_v28 = vld [vmem:[%s4398_s7 + $0x18] sm:$0xff]   ;;  %v3099_v29 = vld [vmem:[%s4400_s9 + $0x8] sm:$0xff]   ;;  %v3406_v50 = vmov 1.0|1.0   ;;  %vm1107_vm4 = vcmp.gt.f32.partialorder %v3772_v7, 0.0 }
 0x230   : > { %2771 = vmatpush3.bf16.msra.mxu1 %v3090_v17  ;;  %2786 = vmatprep.mubr.msk.bf16.mxu1 %vm3404_vm1, %v3403_v18  ;;  %1253 = vst [vmem:[#allocation4 + $0x8] sm:$0xf] %v856_v22  ;;  %v3094_v30 = vld [vmem:[%s4398_s7 + $0x20] sm:$0xff]   ;;  %v3100_v31 = vld [vmem:[%s4400_s9 + $0x10] sm:$0xff]   ;;  %v3095_v32 = vld [vmem:[%s4398_s7 + $0x28] sm:$0xff]   ;;  %vm1106_vm5 = vcmp.gt.f32.partialorder %v3767_v6, 0.0 }
 0x231   : > { %2772 = vmatprep.subr.bf16.mxu1 %v3403_v18  ;;  %3088 = vset.pattern.permute.xlu0 %v3405_v24  ;;  %v3101_v33 = vld [vmem:[%s4400_s9 + $0x18] sm:$0xff]   ;;  %v3096_v34 = vld [vmem:[%s4398_s7 + $0x30] sm:$0xff]   ;;  %v3102_v35 = vld [vmem:[%s4400_s9 + $0x20] sm:$0xff]   ;;  %vm1111_vm6 = vcmp.gt.f32.partialorder %v3795_v12, 0.0  ;;  %vm1122_vm7 = vcmask 7168   ;;  %vm1110_vm8 = vcmp.gt.f32.partialorder %v3790_v11, 0.0 }
 0x232   : > { %746 = vperm.xlu0 %3088, %v3384_v16   ;;  %2766 = vmatprep.mubr.msk.bf16.mxu0 %vm3404_vm1, %v3403_v18  ;;  %v3097_v37 = vld [vmem:[%s4398_s7 + $0x38] sm:$0xff]   ;;  %v3103_v38 = vld [vmem:[%s4400_s9 + $0x28] sm:$0xff]   ;;  %v3104_v39 = vld [vmem:[%s4400_s9 + $0x30] sm:$0xff]   ;;  %vm1109_vm9 = vcmp.gt.f32.partialorder %v3785_v10, 0.0  ;;  %vm1108_vm10 = vcmp.gt.f32.partialorder %v3777_v8, 0.0  ;;  %vm1113_vm11 = vcmp.gt.f32.partialorder %v3806_v15, 0.0 }
 0x233   : > { %3089 = vset.pattern.permute.xlu1 %v3405_v24  ;;  %2751 = vmatpush3.bf16.msra.mxu0 %v3098_v27  ;;  %v985_v40 = vld [vmem:[%s4399_s8] sm:$0xff]  ;;  %v986_v41 = vld [vmem:[%s4399_s8 + $0x8] sm:$0xff]  ;;  %v3105_v42 = vld [vmem:[%s4400_s9 + $0x38] sm:$0xff]   ;;  %vm1112_vm12 = vcmp.gt.f32.partialorder %v3801_v14, 0.0  ;;  %s2639_s29 = sshll.u32 %s3396_s18, 3  ;;  %s2358_s16 = sld [smem:[#allocation5 + %s3396_s18]] }
 0x234   : > { %2773 = vmatpush3.bf16.msra.mxu1 %v3091_v19  ;;  %2752 = vmatprep.subr.bf16.mxu0 %v3403_v18  ;;  %v2854_v43 = vpack.c.bf16 %v986_v41, %v985_v40  ;;  %v987_v44 = vld [vmem:[%s4399_s8 + $0x10] sm:$0xff]  ;;  %v988_v45 = vld [vmem:[%s4399_s8 + $0x18] sm:$0xff]  ;;  %v989_v48 = vld [vmem:[%s4399_s8 + $0x20] sm:$0xff]  ;;  %s2380_s30 = scalar_lea.vmem %s4406_s15, %s2639_s29  ;;  %s2383_s21 = scalar_lea.vmem %s4401_s10, %s2639_s29 }
 0x235   : > { %2774 = vmatprep.subr.bf16.mxu1 %v3403_v18  ;;  %v2858_v47 = vpack.c.bf16 %v988_v45, %v987_v44  ;;  %v990_v49 = vld [vmem:[%s4399_s8 + $0x28] sm:$0xff]  ;;  %v991_v52 = vld [vmem:[%s4399_s8 + $0x30] sm:$0xff]  ;;  %v992_v53 = vld [vmem:[%s4399_s8 + $0x38] sm:$0xff]  ;;  %s741_s18 = sadd.s32 1, %s3396_s18  }
 0x236   : > { %v2862_v51 = vpack.c.bf16 %v990_v49, %v989_v48  ;;  %v2866_v54 = vpack.c.bf16 %v992_v53, %v991_v52  ;;  %v993_v55 = vld [vmem:[%s4399_s8 + $0x40] sm:$0xff]  ;;  %v994_v57 = vld [vmem:[%s4399_s8 + $0x48] sm:$0xff]  ;;  %v995_v59 = vld [vmem:[%s4399_s8 + $0x50] sm:$0xff]  ;;  %p738_p7 = scmp.ge.s32.totalorder %s741_s18, 7  }
 0x237   : > { %2753 = vmatpush3.bf16.msra.mxu0 %v3099_v29  ;;  %v2870_v58 = vpack.c.bf16 %v994_v57, %v993_v55  ;;  %v996_v60 = vld [vmem:[%s4399_s8 + $0x58] sm:$0xff]  ;;  %v997_v62 = vld [vmem:[%s4399_s8 + $0x60] sm:$0xff]  ;;  %v998_v63 = vld [vmem:[%s4399_s8 + $0x68] sm:$0xff] }
 0x238   : > { %2775 = vmatpush3.bf16.msra.mxu1 %v3092_v25  ;;  %2754 = vmatprep.subr.bf16.mxu0 %v3403_v18  ;;  %v2874_v61 = vpack.c.bf16 %v996_v60, %v995_v59  ;;  %v2878_v1 = vpack.c.bf16 %v998_v63, %v997_v62  ;;  %v999_v2 = vld [vmem:[%s4399_s8 + $0x70] sm:$0xff]  ;;  %v1000_v0 = vld [vmem:[%s4399_s8 + $0x78] sm:$0xff]  ;;  %v961_v4 = vld [vmem:[#allocation3] sm:$0xff] }
 0x239   : > { %2776 = vmatprep.subr.bf16.mxu1 %v3403_v18  ;;  %v2882_v3 = vpack.c.bf16 %v1000_v0, %v999_v2  ;;  %v962_v9 = vld [vmem:[#allocation3 + $0x8] sm:$0xff]  ;;  %v963_v16 = vld [vmem:[#allocation3 + $0x10] sm:$0xff]  ;;  %v964_v19 = vld [vmem:[#allocation3 + $0x18] sm:$0xff]  ;;  %p2359_p6 = scmp.gt.s32.totalorder %s2358_s16, 0 }
 0x23a   : > { %v965_v29 = vld [vmem:[#allocation3 + $0x20] sm:$0xff]  ;;  %v3109_v55 = vld [vmem:[%s4402_s11 + $0x8] ss:$16 sps:$4 sm:$0xff]   ;;  %v3111_v57 = vld [vmem:[%s4402_s11 + $0xc] ss:$16 sps:$4 sm:$0xff]  }
 0x23b   : > { %2755 = vmatpush3.bf16.msra.mxu0 %v3100_v31  ;;  %v3106_v53 = vld [vmem:[%s4402_s11] ss:$16 sps:$4 sm:$0xff]   ;;  %v3117_v59 = vld [vmem:[%s4402_s11 + $0x2c] ss:$16 sps:$4 sm:$0xff]   ;;  %v3120_v62 = vld [vmem:[%s4402_s11 + $0x44] ss:$16 sps:$4 sm:$0xff]  }
 0x23c   : > { %2777 = vmatpush3.bf16.msra.mxu1 %v3093_v28  ;;  %2756 = vmatprep.subr.bf16.mxu0 %v3403_v18  ;;  %v3112_v60 = vld [vmem:[%s4402_s11 + $0x20] ss:$16 sps:$4 sm:$0xff]   ;;  %v3123_v63 = vld [vmem:[%s4402_s11 + $0x4c] ss:$16 sps:$4 sm:$0xff]   ;;  %v3121_v2 = vld [vmem:[%s4402_s11 + $0x48] ss:$16 sps:$4 sm:$0xff]  }
 0x23d   : > { %2778 = vmatprep.subr.bf16.mxu1 %v3403_v18  ;;  %v3126_v0 = vld [vmem:[%s4402_s11 + $0x64] ss:$16 sps:$4 sm:$0xff]   ;;  %s2362_s19 = scalar_select %p2359_p6, 1, 0 }
 0x23f   : > { %2757 = vmatpush3.bf16.msra.mxu0 %v3101_v33  ;;  %v966_v33 = vld [vmem:[#allocation3 + $0x28] sm:$0xff] }
 0x240   : > { %2779 = vmatpush3.bf16.msra.mxu1 %v3094_v30  ;;  %2758 = vmatprep.subr.bf16.mxu0 %v3403_v18 }
 0x241   : > { %2780 = vmatprep.subr.bf16.mxu1 %v3403_v18 }
 0x243   : > { %2759 = vmatpush3.bf16.msra.mxu0 %v3102_v35  ;;  %v967_v35 = vld [vmem:[#allocation3 + $0x30] sm:$0xff] }
 0x244   : > { %2781 = vmatpush3.bf16.msra.mxu1 %v3095_v32  ;;  %2760 = vmatprep.subr.bf16.mxu0 %v3403_v18 }
 0x245   : > { %2782 = vmatprep.subr.bf16.mxu1 %v3403_v18 }
 0x247   : > { %2761 = vmatpush3.bf16.msra.mxu0 %v3103_v38  ;;  %v968_v38 = vld [vmem:[#allocation3 + $0x38] sm:$0xff] }
 0x248   : > { %2783 = vmatpush3.bf16.msra.mxu1 %v3096_v34  ;;  %2762 = vmatprep.subr.bf16.mxu0 %v3403_v18 }
 0x249   : > { %2784 = vmatprep.subr.bf16.mxu1 %v3403_v18 }
 0x24b   : > { %2763 = vmatpush3.bf16.msra.mxu0 %v3104_v39 }
 0x24c   : > { %2785 = vmatpush3.bf16.msra.mxu1 %v3097_v37  ;;  %2764 = vmatprep.subr.bf16.mxu0 %v3403_v18 }
 0x24f   : > { %2787 = vmatmul.mubr.bf16.vlgmr.msra.gmra.mrb[0].mxu1 %v856_v22  ;;  %2765 = vmatpush3.bf16.msra.mxu0 %v3105_v42 }
 0x250   : > { %2855 = vmatprep.subr.bf16.mxu0 %v2854_v43 }
 0x2b1   : > { %v747_v46 = vpop.permute.xlu0 %746 }
 0x2b2   : > { %vm748_vm2 = vcmp.eq.s32.totalorder %v3762_v5, %v747_v46 }
 0x2b3   : > { %vm2499_vm3 = vmpackc.low %vm748_vm2, %vm748_vm2 }
 0x2b4   : > { %2767 = vmatmul.mubr.msk.bf16.vlgmr.msra.gmra.mrb[0].mxu0 %vm2499_vm3, %v3406_v50 }
 0x2b5   : > { %2857 = vmatpush3.bf16.msra.mxu0 %v2854_v43 }
 0x2b6   : > { %2859 = vmatprep.subr.bf16.mxu0 %v2858_v47 }
 0x2b9   : > { %2861 = vmatpush3.bf16.msra.mxu0 %v2858_v47 }
 0x2ba   : > { %2863 = vmatprep.subr.bf16.mxu0 %v2862_v51 }
 0x2bd   : > { %2865 = vmatpush3.bf16.msra.mxu0 %v2862_v51 }
 0x2be   : > { %2867 = vmatprep.subr.bf16.mxu0 %v2866_v54 }
 0x2c1   : > { %2869 = vmatpush3.bf16.msra.mxu0 %v2866_v54  ;;  %v3108_v54 = vld [vmem:[%s4402_s11 + $0x4] ss:$16 sps:$4 sm:$0xff]  }
 0x2c2   : > { %2871 = vmatprep.subr.bf16.mxu0 %v2870_v58  ;;  %1865 = vmatprep.subr.bf16.mxu1 %v3108_v54 }
 0x2c3   : > { %1866 = vmatpush1.bf16.msra.mxu1 %v3106_v53 }
 0x2c5   : > { %2873 = vmatpush3.bf16.msra.mxu0 %v2870_v58  ;;  %v3114_v58 = vld [vmem:[%s4402_s11 + $0x24] ss:$16 sps:$4 sm:$0xff]  }
 0x2c6   : > { %2875 = vmatprep.subr.bf16.mxu0 %v2874_v61  ;;  %1867 = vmatprep.subr.bf16.mxu1 %v3114_v58 }
 0x2c7   : > { %1868 = vmatpush1.bf16.msra.mxu1 %v3112_v60 }
 0x2c8   : > { %1869 = vmatprep.subr.bf16.mxu1 %v3120_v62 }
 0x2c9   : > { %2877 = vmatpush3.bf16.msra.mxu0 %v2874_v61  ;;  %v3115_v61 = vld [vmem:[%s4402_s11 + $0x28] ss:$16 sps:$4 sm:$0xff]  }
 0x2ca   : > { %2879 = vmatprep.subr.bf16.mxu0 %v2878_v1 }
 0x2cd   : > { %2881 = vmatpush3.bf16.msra.mxu0 %v2878_v1  ;;  %v3118_v1 = vld [vmem:[%s4402_s11 + $0x40] ss:$16 sps:$4 sm:$0xff]  }
 0x2ce   : > { %2883 = vmatprep.subr.bf16.mxu0 %v2882_v3  ;;  %1870 = vmatpush1.bf16.msra.mxu1 %v3118_v1 }
 0x2cf   : > { %1871 = vmatprep.subr.bf16.mxu1 %v3126_v0 }
 0x2d1   : > { %2885 = vmatpush3.bf16.msra.mxu0 %v2882_v3  ;;  %v3129_v3 = vld [vmem:[%s4402_s11 + $0x6c] ss:$16 sps:$4 sm:$0xff]  }
 0x2d2   : > { %1947 = vmatprep.subr.bf16.mxu0 %v3111_v57 }
 0x322   : > { %v955_v17 = vpop.f32.mrb[0].mxu1 }
 0x323   : > { %v969_v22 = vadd.f32 %v961_v4, %v955_v17  ;;  %v970_v25 = vadd.f32 %v962_v9, %v955_v17  ;;  %v971_v27 = vadd.f32 %v963_v16, %v955_v17  ;;  %v2788_v28 = vpop.f32.mrb[1].mxu1  ;;  %v972_v32 = vadd.f32 %v964_v19, %v955_v17  ;;  %v3124_v4 = vld [vmem:[%s4402_s11 + $0x60] ss:$16 sps:$4 sm:$0xff]   ;;  %v3127_v9 = vld [vmem:[%s4402_s11 + $0x68] ss:$16 sps:$4 sm:$0xff]  }
 0x324   : > { %v958_v30 = vpop.f32.mrb[2].mxu1  ;;  %v973_v34 = vadd.f32 %v965_v29, %v955_v17  ;;  %v974_v37 = vadd.f32 %v966_v33, %v955_v17  ;;  %v975_v39 = vadd.f32 %v967_v35, %v955_v17  ;;  %v976_v40 = vadd.f32 %v968_v38, %v955_v17  ;;  %v3132_v16 = vld [vmem:[%s4402_s11 + $0x84] ss:$16 sps:$4 sm:$0xff]   ;;  %v3135_v17 = vld [vmem:[%s4402_s11 + $0x8c] ss:$16 sps:$4 sm:$0xff]   ;;  %1872 = vmatpush1.bf16.msra.mxu1 %v3124_v4 }
 0x325   : > { %3276 = vtanh.f32 %v969_v22  ;;  %v2789_v31 = vpop.f32.mrb[3].mxu1  ;;  %v3130_v19 = vld [vmem:[%s4402_s11 + $0x80] ss:$16 sps:$4 sm:$0xff]   ;;  %1873 = vmatprep.subr.bf16.mxu1 %v3132_v16  ;;  %v3133_v22 = vld [vmem:[%s4402_s11 + $0x88] ss:$16 sps:$4 sm:$0xff]  }
 0x326   : > { %3278 = vtanh.f32 %v970_v25  ;;  %v3138_v25 = vld [vmem:[%s4402_s11 + $0xa4] ss:$16 sps:$4 sm:$0xff]   ;;  %v3136_v28 = vld [vmem:[%s4402_s11 + $0xa0] ss:$16 sps:$4 sm:$0xff]   ;;  %v3139_v29 = vld [vmem:[%s4402_s11 + $0xa8] ss:$16 sps:$4 sm:$0xff]  }
 0x327   : > { %3280 = vtanh.f32 %v971_v27  ;;  %v3141_v27 = vld [vmem:[%s4402_s11 + $0xac] ss:$16 sps:$4 sm:$0xff]   ;;  %v3144_v30 = vld [vmem:[%s4402_s11 + $0xc4] ss:$16 sps:$4 sm:$0xff]   ;;  %v3145_v33 = vld [vmem:[%s4402_s11 + $0xc8] ss:$16 sps:$4 sm:$0xff]  }
 0x328   : > { %3282 = vtanh.f32 %v972_v32  ;;  %1874 = vmatpush1.bf16.msra.mxu1 %v3130_v19  ;;  %v3147_v31 = vld [vmem:[%s4402_s11 + $0xcc] ss:$16 sps:$4 sm:$0xff]   ;;  %v3142_v32 = vld [vmem:[%s4402_s11 + $0xc0] ss:$16 sps:$4 sm:$0xff]   ;;  %v3151_v38 = vld [vmem:[%s4402_s11 + $0xe8] ss:$16 sps:$4 sm:$0xff]  }
 0x329   : > { %3284 = vtanh.f32 %v973_v34  ;;  %1875 = vmatprep.subr.bf16.mxu1 %v3138_v25  ;;  %v3150_v34 = vld [vmem:[%s4402_s11 + $0xe4] ss:$16 sps:$4 sm:$0xff]   ;;  %v3153_v35 = vld [vmem:[%s4402_s11 + $0xec] ss:$16 sps:$4 sm:$0xff]  }
 0x32a   : > { %3286 = vtanh.f32 %v974_v37  ;;  %v3148_v37 = vld [vmem:[%s4402_s11 + $0xe0] ss:$16 sps:$4 sm:$0xff]  }
 0x32b   : > { %3288 = vtanh.f32 %v975_v39  ;;  %v3156_v39 = vld [vmem:[%s4402_s11 + $0x104] ss:$16 sps:$4 sm:$0xff]  }
 0x32c   : > { %3290 = vtanh.f32 %v976_v40  ;;  %1876 = vmatpush1.bf16.msra.mxu1 %v3136_v28  ;;  %v3159_v40 = vld [vmem:[%s4402_s11 + $0x10c] ss:$16 sps:$4 sm:$0xff]  }
 0x32d   : > { %1877 = vmatprep.subr.bf16.mxu1 %v3144_v30 }
 0x32f   : > { %v3277_v41 = vpop.eup %3276 }
 0x330   : > { %v3279_v42 = vpop.eup %3278  ;;  %2822 = vmatprep.mubr.f32.mxu0 %v3277_v41  ;;  %1878 = vmatpush1.bf16.msra.mxu1 %v3142_v32  ;;  %v3154_v41 = vld [vmem:[%s4402_s11 + $0x100] ss:$16 sps:$4 sm:$0xff]  }
 0x331   : > { %v3281_v43 = vpop.eup %3280  ;;  %2823 = vmatmul.mubr.f32.vlgmr.msra.gmra.mrb[4].mxu0 %v3279_v42  ;;  %1879 = vmatprep.subr.bf16.mxu1 %v3150_v34  ;;  %v3157_v42 = vld [vmem:[%s4402_s11 + $0x108] ss:$16 sps:$4 sm:$0xff]  }
 0x332   : > { %2825 = vmatprep.mubr.f32.mxu0 %v3281_v43  ;;  %v3283_v44 = vpop.eup %3282  ;;  %1948 = vmatpush1.bf16.msra.mxu0 %v3109_v55 }
 0x333   : > { %v3285_v45 = vpop.eup %3284  ;;  %1949 = vmatprep.subr.bf16.mxu0 %v3117_v59 }
 0x334   : > { %v3287_v46 = vpop.eup %3286  ;;  %1880 = vmatpush1.bf16.msra.mxu1 %v3148_v37 }
 0x335   : > { %2826 = vmatmul.mubr.f32.gmra.mrb[6].mxu0 %v3283_v44  ;;  %v3289_v47 = vpop.eup %3288  ;;  %1881 = vmatprep.subr.bf16.mxu1 %v3156_v39 }
 0x336   : > { %2828 = vmatprep.mubr.f32.mxu0 %v3285_v45  ;;  %v3291_v48 = vpop.eup %3290  ;;  %1950 = vmatpush1.bf16.msra.mxu0 %v3115_v61 }
 0x337   : > { %1951 = vmatprep.subr.bf16.mxu0 %v3123_v63 }
 0x338   : > { %1882 = vmatpush1.bf16.msra.mxu1 %v3154_v41 }
 0x339   : > { %2829 = vmatmul.mubr.f32.gmra.mrb[8].mxu0 %v3287_v46 }
 0x33a   : > { %2831 = vmatprep.mubr.f32.mxu0 %v3289_v47  ;;  %1952 = vmatpush1.bf16.msra.mxu0 %v3121_v2 }
 0x33b   : > { %1953 = vmatprep.subr.bf16.mxu0 %v3129_v3 }
 0x33d   : > { %2832 = vmatmul.mubr.f32.gmra.mrb[10].mxu0 %v3291_v48 }
 0x33e   : > { %1954 = vmatpush1.bf16.msra.mxu0 %v3127_v9 }
 0x33f   : > { %1955 = vmatprep.subr.bf16.mxu0 %v3135_v17 }
 0x342   : > { %1956 = vmatpush1.bf16.msra.mxu0 %v3133_v22 }
 0x343   : > { %1957 = vmatprep.subr.bf16.mxu0 %v3141_v27 }
 0x346   : > { %1958 = vmatpush1.bf16.msra.mxu0 %v3139_v29 }
 0x347   : > { %1959 = vmatprep.subr.bf16.mxu0 %v3147_v31 }
 0x34a   : > { %1960 = vmatpush1.bf16.msra.mxu0 %v3145_v33 }
 0x34b   : > { %1961 = vmatprep.subr.bf16.mxu0 %v3153_v35 }
 0x34e   : > { %1962 = vmatpush1.bf16.msra.mxu0 %v3151_v38 }
 0x34f   : > { %1963 = vmatprep.subr.bf16.mxu0 %v3159_v40 }
 0x352   : > { %1964 = vmatpush1.bf16.msra.mxu0 %v3157_v42 }
 0x387   : > { %v3946_v49 = vpop.f32.mrb[0].mxu0 }
 0x388   : > { %v2768_v50 = vpop.f32.mrb[1].mxu0 }
 0x389   : > { %v853_v51 = vpop.f32.mrb[2].mxu0 }
 0x38a   : > { %v2769_v52 = vpop.f32.mrb[3].mxu0 }
 0x404   : > { %v2824_v43 = vpop.f32.mrb[4].mxu0 }
 0x405   : > { %v1067_v44 = vpop.f32.mrb[5].mxu0  ;;  %v1115_v47 = vsel %vm1107_vm4, %v2824_v43, -1e+10 }
 0x406   : > { %v1114_v48 = vsel %vm1106_vm5, %v1067_v44, -1e+10  ;;  %v1124_v53 = vsel %vm1122_vm7, %v1115_v47, -inf }
 0x407   : > { %v1123_v57 = vsel %vm1122_vm7, %v1114_v48, -inf }
 0x408   : > { %v2827_v45 = vpop.f32.mrb[6].mxu0 }
 0x409   : > { %v1077_v46 = vpop.f32.mrb[7].mxu0  ;;  %v1117_v58 = vsel %vm1109_vm9, %v2827_v45, -1e+10 }
 0x40a   : > { %v1116_v61 = vsel %vm1108_vm10, %v1077_v46, -1e+10  ;;  %v1126_v0 = vsel %vm1122_vm7, %v1117_v58, -inf }
 0x40b   : > { %v1125_v16 = vsel %vm1122_vm7, %v1116_v61, -inf }
 0x40c   : > { %v2830_v50 = vpop.f32.mrb[8].mxu0 }
 0x40d   : > { %v1119_v51 = vsel %vm1111_vm6, %v2830_v50, -1e+10  ;;  %v1087_v52 = vpop.f32.mrb[9].mxu0 }
 0x40e   : > { %v1129_v54 = vsel %vm1122_vm7, %v1119_v51, -inf  ;;  %v1118_v55 = vsel %vm1110_vm8, %v1087_v52, -1e+10 }
 0x40f   : > { %v1130_v59 = vmax.f32 %v1124_v53, %v1129_v54  ;;  %v1127_v60 = vsel %vm1122_vm7, %v1118_v55, -inf }
 0x410   : > { %v1128_v62 = vmax.f32 %v1123_v57, %v1127_v60  ;;  %v2833_v63 = vpop.f32.mrb[10].mxu0 }
 0x411   : > { %v1121_v1 = vsel %vm1113_vm11, %v2833_v63, -1e+10  ;;  %v1097_v2 = vpop.f32.mrb[11].mxu0 }
 0x412   : > { %v1135_v3 = vmax.f32 %v1128_v62, %v1130_v59  ;;  %v1133_v4 = vsel %vm1122_vm7, %v1121_v1, -inf  ;;  %v1120_v9 = vsel %vm1112_vm12, %v1097_v2, -1e+10 }
 0x413   : > { %v1134_v17 = vmax.f32 %v1126_v0, %v1133_v4  ;;  %v1131_v19 = vsel %vm1122_vm7, %v1120_v9, -inf }
 0x414   : > { %v1132_v22 = vmax.f32 %v1125_v16, %v1131_v19  ;;  %v3162_v16 = vld [vmem:[%s4402_s11 + $0x124] ss:$16 sps:$4 sm:$0xff]   ;;  %v3160_v19 = vld [vmem:[%s4402_s11 + $0x120] ss:$16 sps:$4 sm:$0xff]  }
 0x415   : > { %1883 = vmatprep.subr.bf16.mxu1 %v3162_v16  ;;  %v1188_v16 = vld [vmem:[#allocation2 + $0x10] sm:$0xff] }
 0x416   : > { %v1136_v25 = vmax.f32 %v1132_v22, %v1134_v17  ;;  %v3165_v17 = vld [vmem:[%s4402_s11 + $0x12c] ss:$16 sps:$4 sm:$0xff]   ;;  %v3163_v22 = vld [vmem:[%s4402_s11 + $0x128] ss:$16 sps:$4 sm:$0xff]   ;;  %1884 = vmatpush1.bf16.msra.mxu1 %v3160_v19 }
 0x417   : > { %1965 = vmatprep.subr.bf16.mxu0 %v3165_v17  ;;  %v1189_v19 = vld [vmem:[#allocation2 + $0x18] sm:$0xff] }
 0x418   : > { %v1137_v27 = vmax.f32 %v1135_v3, %v1136_v25  ;;  %1966 = vmatpush1.bf16.msra.mxu0 %v3163_v22 }
 0x41a   : > { %v1140_v28 = vsub.f32 %v1116_v61, %v1137_v27  ;;  %v1141_v29 = vsub.f32 %v1117_v58, %v1137_v27  ;;  %v1142_v30 = vsub.f32 %v1118_v55, %v1137_v27  ;;  %v1143_v31 = vsub.f32 %v1119_v51, %v1137_v27 }
 0x41b   : > { %v1144_v32 = vsub.f32 %v1120_v9, %v1137_v27  ;;  %v1145_v33 = vsub.f32 %v1121_v1, %v1137_v27  ;;  %v1138_v34 = vsub.f32 %v1114_v48, %v1137_v27  ;;  %v1139_v35 = vsub.f32 %v1115_v47, %v1137_v27  ;;  %v3168_v27 = vld [vmem:[%s4402_s11 + $0x144] ss:$16 sps:$4 sm:$0xff]  }
 0x41c   : > { %v1150_v39 = vmul.f32 1.442695, %v1140_v28  ;;  %v1152_v40 = vmul.f32 1.442695, %v1141_v29  ;;  %v1154_v41 = vmul.f32 1.442695, %v1142_v30  ;;  %1885 = vmatprep.subr.bf16.mxu1 %v3168_v27 }
 0x41d   : > { %v1146_v37 = vmul.f32 1.442695, %v1138_v34  ;;  %v1148_v38 = vmul.f32 1.442695, %v1139_v35  ;;  %v1156_v42 = vmul.f32 1.442695, %v1143_v31 }
 0x41e   : > { %v1158_v43 = vmul.f32 1.442695, %v1144_v32  ;;  %v1160_v44 = vmul.f32 1.442695, %v1145_v33  ;;  %v3171_v28 = vld [vmem:[%s4402_s11 + $0x14c] ss:$16 sps:$4 sm:$0xff]  }
 0x41f   : > { %3292 = vpow2.f32 %v1146_v37  ;;  %v3166_v33 = vld [vmem:[%s4402_s11 + $0x140] ss:$16 sps:$4 sm:$0xff]   ;;  %v3169_v34 = vld [vmem:[%s4402_s11 + $0x148] ss:$16 sps:$4 sm:$0xff]   ;;  %1967 = vmatprep.subr.bf16.mxu0 %v3171_v28 }
 0x420   : > { %3294 = vpow2.f32 %v1148_v38  ;;  %1886 = vmatpush1.bf16.msra.mxu1 %v3166_v33  ;;  %1968 = vmatpush1.bf16.msra.mxu0 %v3169_v34  ;;  %v1190_v28 = vld [vmem:[#allocation2 + $0x20] sm:$0xff] }
 0x421   : > { %3296 = vpow2.f32 %v1150_v39 }
 0x422   : > { %3298 = vpow2.f32 %v1152_v40  ;;  %v3174_v40 = vld [vmem:[%s4402_s11 + $0x164] ss:$16 sps:$4 sm:$0xff]  }
 0x423   : > { %3300 = vpow2.f32 %v1154_v41  ;;  %v3177_v41 = vld [vmem:[%s4402_s11 + $0x16c] ss:$16 sps:$4 sm:$0xff]   ;;  %1887 = vmatprep.subr.bf16.mxu1 %v3174_v40 }
 0x424   : > { %3302 = vpow2.f32 %v1156_v42  ;;  %v3172_v42 = vld [vmem:[%s4402_s11 + $0x160] ss:$16 sps:$4 sm:$0xff]   ;;  %1969 = vmatprep.subr.bf16.mxu0 %v3177_v41  ;;  %v1193_v41 = vld [vmem:[#allocation2 + $0x38] sm:$0xff] }
 0x425   : > { %3304 = vpow2.f32 %v1158_v43  ;;  %v3175_v43 = vld [vmem:[%s4402_s11 + $0x168] ss:$16 sps:$4 sm:$0xff]   ;;  %1888 = vmatpush1.bf16.msra.mxu1 %v3172_v42 }
 0x426   : > { %3306 = vpow2.f32 %v1160_v44  ;;  %v3180_v44 = vld [vmem:[%s4402_s11 + $0x184] ss:$16 sps:$4 sm:$0xff]   ;;  %1970 = vmatpush1.bf16.msra.mxu0 %v3175_v43 }
 0x427   : > { %1889 = vmatprep.subr.bf16.mxu1 %v3180_v44 }
 0x429   : > { %v3293_v45 = vpop.eup %3292 }
 0x42a   : > { %v3295_v46 = vpop.eup %3294  ;;  %v1162_v47 = vsel %vm1122_vm7, %v3293_v45, 0.0 }
 0x42b   : > { %v3297_v48 = vpop.eup %3296  ;;  %v1163_v50 = vsel %vm1122_vm7, %v3295_v46, 0.0 }
 0x42c   : > { %v3299_v51 = vpop.eup %3298  ;;  %v1164_v52 = vadd.f32 %v1163_v50, %v1162_v47  ;;  %v1165_v53 = vsel %vm1122_vm7, %v3297_v48, 0.0  ;;  %v3181_v47 = vld [vmem:[%s4402_s11 + $0x188] ss:$16 sps:$4 sm:$0xff]   ;;  %v3189_v50 = vld [vmem:[%s4402_s11 + $0x1ac] ss:$16 sps:$4 sm:$0xff]  }
 0x42d   : > { %v3301_v54 = vpop.eup %3300  ;;  %v1167_v57 = vsel %vm1122_vm7, %v3299_v51, 0.0 }
 0x42e   : > { %v1166_v55 = vadd.f32 %v1165_v53, %v1164_v52  ;;  %v3303_v58 = vpop.eup %3302  ;;  %v1169_v60 = vsel %vm1122_vm7, %v3301_v54, 0.0  ;;  %v3187_v52 = vld [vmem:[%s4402_s11 + $0x1a8] ss:$16 sps:$4 sm:$0xff]   ;;  %v3192_v53 = vld [vmem:[%s4402_s11 + $0x1c4] ss:$16 sps:$4 sm:$0xff]  }
 0x42f   : > { %v3305_v61 = vpop.eup %3304  ;;  %v1171_v63 = vsel %vm1122_vm7, %v3303_v58, 0.0 }
 0x430   : > { %v1168_v59 = vadd.f32 %v1167_v57, %v1166_v55  ;;  %v3307_v1 = vpop.eup %3306  ;;  %v1173_v0 = vsel %vm1122_vm7, %v3305_v61, 0.0  ;;  %v3190_v55 = vld [vmem:[%s4402_s11 + $0x1c0] ss:$16 sps:$4 sm:$0xff]   ;;  %v3193_v57 = vld [vmem:[%s4402_s11 + $0x1c8] ss:$16 sps:$4 sm:$0xff]  }
 0x431   : > { %v1175_v4 = vsel %vm1122_vm7, %v3307_v1, 0.0 }
 0x432   : > { %v1170_v62 = vadd.f32 %v1169_v60, %v1168_v59  ;;  %v3201_v59 = vld [vmem:[%s4402_s11 + $0x1ec] ss:$16 sps:$4 sm:$0xff]   ;;  %v3196_v60 = vld [vmem:[%s4402_s11 + $0x1e0] ss:$16 sps:$4 sm:$0xff]  }
 0x434   : > { %v1172_v2 = vadd.f32 %v1171_v63, %v1170_v62  ;;  %v3204_v62 = vld [vmem:[%s4402_s11 + $0x204] ss:$16 sps:$4 sm:$0xff]   ;;  %v3207_v63 = vld [vmem:[%s4402_s11 + $0x20c] ss:$16 sps:$4 sm:$0xff]  }
 0x436   : > { %v1174_v3 = vadd.f32 %v1173_v0, %v1172_v2  ;;  %v1186_v2 = vld [vmem:[#allocation2] sm:$0xff] }
 0x438   : > { %v1176_v9 = vadd.f32 %v1175_v4, %v1174_v3 }
 0x43a   : > { %3308 = vrcp.f32 %v1176_v9 }
 0x444   : > { %v3309_v25 = vpop.eup %3308 }
 0x445   : > { %v1179_v29 = vmul.f32 %v3309_v25, %v3295_v46  ;;  %v1178_v30 = vmul.f32 %v3309_v25, %v3293_v45  ;;  %v1180_v31 = vmul.f32 %v3309_v25, %v3297_v48  ;;  %v1181_v32 = vmul.f32 %v3309_v25, %v3299_v51  ;;  %v3183_v45 = vld [vmem:[%s4402_s11 + $0x18c] ss:$16 sps:$4 sm:$0xff]   ;;  %v3178_v46 = vld [vmem:[%s4402_s11 + $0x180] ss:$16 sps:$4 sm:$0xff]   ;;  %v3186_v48 = vld [vmem:[%s4402_s11 + $0x1a4] ss:$16 sps:$4 sm:$0xff]  }
 0x446   : > { %v1182_v35 = vmul.f32 %v3309_v25, %v3301_v54  ;;  %v1183_v37 = vmul.f32 %v3309_v25, %v3303_v58  ;;  %v1184_v38 = vmul.f32 %v3309_v25, %v3305_v61  ;;  %v1185_v39 = vmul.f32 %v3309_v25, %v3307_v1  ;;  %1971 = vmatprep.subr.bf16.mxu0 %v3183_v45  ;;  %v3184_v51 = vld [vmem:[%s4402_s11 + $0x1a0] ss:$16 sps:$4 sm:$0xff]   ;;  %v3195_v54 = vld [vmem:[%s4402_s11 + $0x1cc] ss:$16 sps:$4 sm:$0xff]   ;;  %v3198_v58 = vld [vmem:[%s4402_s11 + $0x1e4] ss:$16 sps:$4 sm:$0xff]  }
 0x447   : > { %1201 = vperm.xlu1 %3089, %v1179_v29   ;;  %1196 = vperm.xlu0 %3088, %v1178_v30   ;;  %v3199_v61 = vld [vmem:[%s4402_s11 + $0x1e8] ss:$16 sps:$4 sm:$0xff]  }
 0x448   : > { %1890 = vmatpush1.bf16.msra.mxu1 %v3178_v46  ;;  %1972 = vmatpush1.bf16.msra.mxu0 %v3181_v47  ;;  %v1187_v1 = vld [vmem:[#allocation2 + $0x8] sm:$0xff] }
 0x449   : > { %1891 = vmatprep.subr.bf16.mxu1 %v3186_v48  ;;  %1973 = vmatprep.subr.bf16.mxu0 %v3189_v50  ;;  %v4173_v50 = vpack.c.bf16 %v3946_v49, %v3946_v49 }
 0x44b   : > { %1206 = vperm.xlu1 %3089, %v1180_v31   ;;  %1211 = vperm.xlu0 %3088, %v1181_v32   ;;  %v1191_v32 = vld [vmem:[#allocation2 + $0x28] sm:$0xff] }
 0x44c   : > { %1892 = vmatpush1.bf16.msra.mxu1 %v3184_v51  ;;  %1974 = vmatpush1.bf16.msra.mxu0 %v3187_v52  ;;  %v3202_v52 = vld [vmem:[%s4402_s11 + $0x200] ss:$16 sps:$4 sm:$0xff]  }
 0x44d   : > { %1893 = vmatprep.subr.bf16.mxu1 %v3192_v53  ;;  %1975 = vmatprep.subr.bf16.mxu0 %v3195_v54  ;;  %v3205_v53 = vld [vmem:[%s4402_s11 + $0x208] ss:$16 sps:$4 sm:$0xff]   ;;  %v3210_v54 = vld [vmem:[%s4402_s11 + $0x224] ss:$16 sps:$4 sm:$0xff]  }
 0x44f   : > { %1216 = vperm.xlu1 %3089, %v1182_v35   ;;  %1221 = vperm.xlu0 %3088, %v1183_v37   ;;  %v1192_v37 = vld [vmem:[#allocation2 + $0x30] sm:$0xff] }
 0x450   : > { %1894 = vmatpush1.bf16.msra.mxu1 %v3190_v55  ;;  %1976 = vmatpush1.bf16.msra.mxu0 %v3193_v57  ;;  %v3213_v55 = vld [vmem:[%s4402_s11 + $0x22c] ss:$16 sps:$4 sm:$0xff]   ;;  %v3211_v57 = vld [vmem:[%s4402_s11 + $0x228] ss:$16 sps:$4 sm:$0xff]  }
 0x451   : > { %1895 = vmatprep.subr.bf16.mxu1 %v3198_v58  ;;  %1977 = vmatprep.subr.bf16.mxu0 %v3201_v59  ;;  %v3216_v58 = vld [vmem:[%s4402_s11 + $0x244] ss:$16 sps:$4 sm:$0xff]   ;;  %v3219_v59 = vld [vmem:[%s4402_s11 + $0x24c] ss:$16 sps:$4 sm:$0xff]  }
 0x453   : > { %1226 = vperm.xlu1 %3089, %v1184_v38   ;;  %1231 = vperm.xlu0 %3088, %v1185_v39  }
 0x454   : > { %1896 = vmatpush1.bf16.msra.mxu1 %v3196_v60  ;;  %1978 = vmatpush1.bf16.msra.mxu0 %v3199_v61  ;;  %v3214_v60 = vld [vmem:[%s4402_s11 + $0x240] ss:$16 sps:$4 sm:$0xff]   ;;  %v3217_v61 = vld [vmem:[%s4402_s11 + $0x248] ss:$16 sps:$4 sm:$0xff]  }
 0x455   : > { %1906 = vmatprep.subr.bf16.mxu1 %v3204_v62  ;;  %1988 = vmatprep.subr.bf16.mxu0 %v3207_v63  ;;  %v3222_v62 = vld [vmem:[%s4402_s11 + $0x264] ss:$16 sps:$4 sm:$0xff]   ;;  %v3220_v63 = vld [vmem:[%s4402_s11 + $0x260] ss:$16 sps:$4 sm:$0xff]  }
 0x4c6   : > { %v1202_v0 = vpop.permute.xlu1 %1201  ;;  %v1197_v3 = vpop.permute.xlu0 %1196 }
 0x4c7   : > { %v1235_v4 = vmul.f32 %v1202_v0, %v1187_v1  ;;  %v1234_v9 = vmul.f32 %v1197_v3, %v1186_v2  ;;  %v3223_v1 = vld [vmem:[%s4402_s11 + $0x268] ss:$16 sps:$4 sm:$0xff]   ;;  %v3228_v2 = vld [vmem:[%s4402_s11 + $0x284] ss:$16 sps:$4 sm:$0xff]   ;;  %v3231_v0 = vld [vmem:[%s4402_s11 + $0x28c] ss:$16 sps:$4 sm:$0xff]  }
 0x4c8   : > { %v3226_v3 = vld [vmem:[%s4402_s11 + $0x280] ss:$16 sps:$4 sm:$0xff]  }
 0x4c9   : > { %v1242_v25 = vadd.f32 %v1235_v4, %v1234_v9  ;;  %v3229_v4 = vld [vmem:[%s4402_s11 + $0x288] ss:$16 sps:$4 sm:$0xff]   ;;  %v3234_v9 = vld [vmem:[%s4402_s11 + $0x2a4] ss:$16 sps:$4 sm:$0xff]  }
 0x4ca   : > { %v1207_v17 = vpop.permute.xlu1 %1206  ;;  %v1212_v22 = vpop.permute.xlu0 %1211 }
 0x4cb   : > { %v1236_v27 = vmul.f32 %v1207_v17, %v1188_v16  ;;  %v1237_v30 = vmul.f32 %v1212_v22, %v1189_v19  ;;  %v3237_v16 = vld [vmem:[%s4402_s11 + $0x2ac] ss:$16 sps:$4 sm:$0xff]   ;;  %v3232_v17 = vld [vmem:[%s4402_s11 + $0x2a0] ss:$16 sps:$4 sm:$0xff]   ;;  %v3235_v19 = vld [vmem:[%s4402_s11 + $0x2a8] ss:$16 sps:$4 sm:$0xff]  }
 0x4cc   : > { %v3240_v22 = vld [vmem:[%s4402_s11 + $0x2c4] ss:$16 sps:$4 sm:$0xff]  }
 0x4cd   : > { %v1243_v29 = vadd.f32 %v1242_v25, %v1236_v27  ;;  %v3243_v25 = vld [vmem:[%s4402_s11 + $0x2cc] ss:$16 sps:$4 sm:$0xff]   ;;  %v3238_v27 = vld [vmem:[%s4402_s11 + $0x2c0] ss:$16 sps:$4 sm:$0xff]  }
 0x4ce   : > { %v1217_v31 = vpop.permute.xlu1 %1216  ;;  %v1222_v33 = vpop.permute.xlu0 %1221 }
 0x4cf   : > { %v1244_v34 = vadd.f32 %v1243_v29, %v1237_v30  ;;  %v1238_v35 = vmul.f32 %v1217_v31, %v1190_v28  ;;  %v1239_v39 = vmul.f32 %v1222_v33, %v1191_v32  ;;  %v3241_v28 = vld [vmem:[%s4402_s11 + $0x2c8] ss:$16 sps:$4 sm:$0xff]   ;;  %v3246_v29 = vld [vmem:[%s4402_s11 + $0x2e4] ss:$16 sps:$4 sm:$0xff]   ;;  %v3249_v30 = vld [vmem:[%s4402_s11 + $0x2ec] ss:$16 sps:$4 sm:$0xff]  }
 0x4d0   : > { %v3244_v31 = vld [vmem:[%s4402_s11 + $0x2e0] ss:$16 sps:$4 sm:$0xff]   ;;  %v3247_v32 = vld [vmem:[%s4402_s11 + $0x2e8] ss:$16 sps:$4 sm:$0xff]  }
 0x4d1   : > { %v1245_v38 = vadd.f32 %v1244_v34, %v1238_v35  ;;  %v3251_v33 = vld [vmem:[%s4404_s13 + $0x40] sm:$0xff]   ;;  %v3250_v34 = vld [vmem:[#allocation4 + $0x8] ss:$0 sps:$4 sm:$0xff]  }
 0x4d2   : > { %v1227_v40 = vpop.permute.xlu1 %1226  ;;  %v1232_v42 = vpop.permute.xlu0 %1231  ;;  %v3252_v35 = vld [vmem:[%s4404_s13] sm:$0xff]  }
 0x4d3   : > { %v1246_v43 = vadd.f32 %v1245_v38, %v1239_v39  ;;  %v1240_v44 = vmul.f32 %v1227_v40, %v1192_v37  ;;  %v1241_v46 = vmul.f32 %v1232_v42, %v1193_v41  ;;  %v3253_v37 = vld [vmem:[%s4404_s13 + $0x48] sm:$0xff]   ;;  %v3255_v39 = vld [vmem:[%s4404_s13 + $0x50] sm:$0xff]   ;;  %v3257_v41 = vld [vmem:[%s4404_s13 + $0x58] sm:$0xff]  }
 0x4d4   : > { %v3254_v38 = vld [vmem:[%s4404_s13 + $0x8] sm:$0xff]   ;;  %v3256_v40 = vld [vmem:[%s4404_s13 + $0x10] sm:$0xff]   ;;  %v3258_v42 = vld [vmem:[%s4404_s13 + $0x18] sm:$0xff]  }
 0x4d5   : > { %v1247_v45 = vadd.f32 %v1246_v43, %v1240_v44  ;;  %v3259_v43 = vld [vmem:[%s4404_s13 + $0x60] sm:$0xff]  }
 0x4d6   : > { %v3260_v44 = vld [vmem:[%s4404_s13 + $0x20] sm:$0xff]  }
 0x4d7   : > { %v1248_v47 = vadd.f32 %v1247_v45, %v1241_v46  ;;  %v3261_v45 = vld [vmem:[%s4404_s13 + $0x68] sm:$0xff]  }
 0x4d8   : > { %v3262_v46 = vld [vmem:[%s4404_s13 + $0x28] sm:$0xff]  }
 0x4d9   : > { %v2646_v48 = vpack.c.bf16 %v1248_v47, %v3946_v49  ;;  %v4175_v51 = vpack.c.bf16 %v1248_v47, %v1248_v47  ;;  %v3208_v49 = vld [vmem:[%s4402_s11 + $0x220] ss:$16 sps:$4 sm:$0xff]  }
 0x4da   : > { %v3263_v47 = vld [vmem:[%s4404_s13 + $0x70] sm:$0xff]  }
 0x4db   : > { %2647 = vst [vmem:[#allocation4] sm:$0xff] %v2646_v48   ;;  %1897 = vmatprep.mubr.bf16.mxu1 %v4175_v51  ;;  %1979 = vmatprep.mubr.bf16.mxu0 %v4175_v51  ;;  %v3264_v48 = vld [vmem:[%s4404_s13 + $0x30] sm:$0xff]  }
 0x4dc   : > { %1898 = vmatmul.mubr.bf16.vlgmr.msra.gmra.mrb[4].mxu1 %v4173_v50  ;;  %1980 = vmatmul.mubr.bf16.vlgmr.msra.gmra.mrb[12].mxu0 %v4173_v50 }
 0x4dd   : > { %1907 = vmatpush1.bf16.msra.mxu1 %v3202_v52  ;;  %1989 = vmatpush1.bf16.msra.mxu0 %v3205_v53  ;;  %v3266_v52 = vld [vmem:[%s4404_s13 + $0x38] sm:$0xff]   ;;  %v3267_v53 = vld [vmem:[%s4404_s13 + $0x80] sm:$0xff]  }
 0x4de   : > { %1908 = vmatprep.subr.bf16.mxu1 %v3210_v54  ;;  %1990 = vmatprep.subr.bf16.mxu0 %v3213_v55  ;;  %v3268_v54 = vld [vmem:[%s4404_s13 + $0x88] sm:$0xff]   ;;  %v3269_v55 = vld [vmem:[%s4404_s13 + $0x90] sm:$0xff]  }
 0x4df   : > { %1938 = vmatprep.mubr.bf16.mxu1 %v3405_v24  ;;  %2020 = vmatprep.mubr.bf16.mxu0 %v3405_v24  ;;  %v3225_v24 = vld [vmem:[%s4402_s11 + $0x26c] ss:$16 sps:$4 sm:$0xff]  }
 0x4e1   : > { %1909 = vmatpush1.bf16.msra.mxu1 %v3208_v49  ;;  %1991 = vmatpush1.bf16.msra.mxu0 %v3211_v57  ;;  %v3271_v49 = vld [vmem:[%s4404_s13 + $0xa0] sm:$0xff]   ;;  %v3272_v57 = vld [vmem:[%s4404_s13 + $0xa8] sm:$0xff]  }
 0x4e2   : > { %1910 = vmatprep.subr.bf16.mxu1 %v3216_v58  ;;  %1992 = vmatprep.subr.bf16.mxu0 %v3219_v59  ;;  %v3273_v58 = vld [vmem:[%s4404_s13 + $0xb0] sm:$0xff]   ;;  %v3274_v59 = vld [vmem:[%s4404_s13 + $0xb8] sm:$0xff]  }
 0x4e5   : > { %1911 = vmatpush1.bf16.msra.mxu1 %v3214_v60  ;;  %1993 = vmatpush1.bf16.msra.mxu0 %v3217_v61  ;;  %v1352_v60 = vld [vmem:[%s4403_s12] sm:$0xf] }
 0x4e6   : > { %1912 = vmatprep.subr.bf16.mxu1 %v3222_v62  ;;  %1994 = vmatprep.subr.bf16.mxu0 %v3225_v24  ;;  %v1357_v61 = vrot.slane %v1352_v60, %v147_v21  ;;  %v1361_v62 = vrot.slane %v1352_v60, %v151_v23 }
 0x4e9   : > { %1913 = vmatpush1.bf16.msra.mxu1 %v3220_v63  ;;  %1995 = vmatpush1.bf16.msra.mxu0 %v3223_v1 }
 0x4ea   : > { %1914 = vmatprep.subr.bf16.mxu1 %v3228_v2  ;;  %1996 = vmatprep.subr.bf16.mxu0 %v3231_v0 }
 0x4ed   : > { %1915 = vmatpush1.bf16.msra.mxu1 %v3226_v3  ;;  %1997 = vmatpush1.bf16.msra.mxu0 %v3229_v4 }
 0x4ee   : > { %1916 = vmatprep.subr.bf16.mxu1 %v3234_v9  ;;  %1998 = vmatprep.subr.bf16.mxu0 %v3237_v16 }
 0x4f1   : > { %1917 = vmatpush1.bf16.msra.mxu1 %v3232_v17  ;;  %1999 = vmatpush1.bf16.msra.mxu0 %v3235_v19 }
 0x4f2   : > { %1918 = vmatprep.subr.bf16.mxu1 %v3240_v22  ;;  %2000 = vmatprep.subr.bf16.mxu0 %v3243_v25  ;;  %v1369_v22 = vrot.slane %v1352_v60, %v159_v26 }
 0x4f5   : > { %1919 = vmatpush1.bf16.msra.mxu1 %v3238_v27  ;;  %2001 = vmatpush1.bf16.msra.mxu0 %v3241_v28  ;;  %v1365_v27 = vrot.slane %v1352_v60, %v155_v36 }
 0x4f6   : > { %1920 = vmatprep.subr.bf16.mxu1 %v3246_v29  ;;  %2002 = vmatprep.subr.bf16.mxu0 %v3249_v30 }
 0x4f9   : > { %1921 = vmatpush1.bf16.msra.mxu1 %v3244_v31  ;;  %2003 = vmatpush1.bf16.msra.mxu0 %v3247_v32 }
 0x4fa   : > { %2699 = vmatprep.subr.bf16.mxu1 %v3251_v33  ;;  %2834 = vmatprep.subr.bf16.mxu0 %v3403_v18 }
 0x4fc   : > { %1939 = vmatmul.mubr.bf16.vlgmr.msra.gmra.mrb[4].mxu1 %v3250_v34  ;;  %2021 = vmatmul.mubr.bf16.vlgmr.msra.gmra.mrb[12].mxu0 %v3250_v34 }
 0x4fd   : > { %2700 = vmatpush3.bf16.msra.mxu1 %v3252_v35  ;;  %2299 = vmatprep.mubr.bf16.mxu1 %v4175_v51  ;;  %v3265_v51 = vld [vmem:[%s4404_s13 + $0x78] sm:$0xff]  }
 0x4fe   : > { %2701 = vmatprep.subr.bf16.mxu1 %v3253_v37  ;;  %2850 = vmatprep.mubr.msk.bf16.mxu0 %vm3404_vm1, %v3403_v18 }
 0x4ff   : > { %2835 = vmatpush3.bf16.msra.mxu0 %v3267_v53  ;;  %v2611_v53 = vld [vmem:[%s4405_s14] ss:$0 sm:$0xff] }
 0x500   : > { %2836 = vmatprep.subr.bf16.mxu0 %v3403_v18 }
 0x501   : > { %2702 = vmatpush3.bf16.msra.mxu1 %v3254_v38 }
 0x502   : > { %2703 = vmatprep.subr.bf16.mxu1 %v3255_v39 }
 0x503   : > { %2837 = vmatpush3.bf16.msra.mxu0 %v3268_v54 }
 0x504   : > { %2838 = vmatprep.subr.bf16.mxu0 %v3403_v18 }
 0x505   : > { %2704 = vmatpush3.bf16.msra.mxu1 %v3256_v40 }
 0x506   : > { %2705 = vmatprep.subr.bf16.mxu1 %v3257_v41 }
 0x507   : > { %2839 = vmatpush3.bf16.msra.mxu0 %v3269_v55 }
 0x508   : > { %2840 = vmatprep.subr.bf16.mxu0 %v3403_v18 }
 0x509   : > { %2706 = vmatpush3.bf16.msra.mxu1 %v3258_v42 }
 0x50a   : > { %2707 = vmatprep.subr.bf16.mxu1 %v3259_v43 }
 0x50d   : > { %2708 = vmatpush3.bf16.msra.mxu1 %v3260_v44 }
 0x50e   : > { %2709 = vmatprep.subr.bf16.mxu1 %v3261_v45 }
 0x511   : > { %2710 = vmatpush3.bf16.msra.mxu1 %v3262_v46 }
 0x512   : > { %2711 = vmatprep.subr.bf16.mxu1 %v3263_v47 }
 0x515   : > { %2712 = vmatpush3.bf16.msra.mxu1 %v3264_v48 }
 0x516   : > { %2713 = vmatprep.subr.bf16.mxu1 %v3265_v51 }
 0x519   : > { %2714 = vmatpush3.bf16.msra.mxu1 %v3266_v52 }
 0x51c   : > { %2300 = vmatmul.mubr.bf16.vlgmr.msra.gmra.mrb[8].mxu1 %v4173_v50  ;;  %v3270_v50 = vld [vmem:[%s4404_s13 + $0x98] sm:$0xff]  }
 0x51d   : > { %2841 = vmatpush3.bf16.msra.mxu0 %v3270_v50 }
 0x51e   : > { %2842 = vmatprep.subr.bf16.mxu0 %v3403_v18 }
 0x521   : > { %2843 = vmatpush3.bf16.msra.mxu0 %v3271_v49 }
 0x522   : > { %2844 = vmatprep.subr.bf16.mxu0 %v3403_v18 }
 0x525   : > { %2845 = vmatpush3.bf16.msra.mxu0 %v3272_v57 }
 0x526   : > { %2846 = vmatprep.subr.bf16.mxu0 %v3403_v18 }
 0x529   : > { %2847 = vmatpush3.bf16.msra.mxu0 %v3273_v58 }
 0x52a   : > { %2848 = vmatprep.subr.bf16.mxu0 %v3403_v18 }
 0x52d   : > { %2849 = vmatpush3.bf16.msra.mxu0 %v3274_v59 }
 0x5cf   : > { %v1940_v24 = vpop.f32.mrb[4].mxu1  ;;  %v2022_v63 = vpop.f32.mrb[12].mxu0 }
 0x5d0   : > { %v2886_v1 = vadd.f32 %v1940_v24, %v1357_v61  ;;  %v1942_v2 = vpop.f32.mrb[5].mxu1  ;;  %v2024_v0 = vpop.f32.mrb[13].mxu0  ;;  %v2888_v29 = vadd.f32 %v2022_v63, %v1365_v27 }
 0x5d1   : > { %v2887_v3 = vadd.f32 %v1942_v2, %v1361_v62  ;;  %v1944_v4 = vpop.f32.mrb[6].mxu1  ;;  %v2026_v9 = vpop.f32.mrb[14].mxu0  ;;  %v2889_v25 = vadd.f32 %v2024_v0, %v1369_v22  ;;  %v2363_v62 = vstv %s2362_s19 }
 0x5d2   : > { %v2608_v18 = vmul.f32 -1.442695, %v2886_v1  ;;  %v1945_v16 = vpop.f32.mrb[7].mxu1  ;;  %v2027_v17 = vpop.f32.mrb[15].mxu0  ;;  %v2642_v1 = vld [vmem:[%s2383_s21 + $0x8] sm:$0xff]  ;;  %vm2364_vm14 = vcmp.eq.s32.totalorder %v2363_v62, 1 }
 0x5d3   : > { %v2609_v19 = vmul.f32 -1.442695, %v2887_v3  ;;  %v2610_v28 = vmul.f32 -1.442695, %v2889_v25 }
 0x5d4   : > { %3310 = vpow2.f32 %v2608_v18 }
 0x5d5   : > { %3312 = vpow2.f32 %v2609_v19 }
 0x5d6   : > { %3314 = vpow2.f32 %v2610_v28 }
 0x5d7   : > { %3316 = vtanh.f32 %v2888_v29 }
 0x5de   : > { %v3311_v30 = vpop.eup %3310 }
 0x5df   : > { %v3313_v31 = vpop.eup %3312  ;;  %v2032_v32 = vadd.f32 1.0, %v3311_v30 }
 0x5e0   : > { %v2038_v33 = vadd.f32 1.0, %v3313_v31  ;;  %v3315_v34 = vpop.eup %3314 }
 0x5e1   : > { %3318 = vrcp.f32 %v2032_v32  ;;  %v3317_v35 = vpop.eup %3316  ;;  %v2045_v40 = vadd.f32 1.0, %v3315_v34 }
 0x5e2   : > { %3320 = vrcp.f32 %v2038_v33 }
 0x5e3   : > { %3322 = vrcp.f32 %v2045_v40 }
 0x5eb   : > { %v3319_v37 = vpop.eup %3318 }
 0x5ec   : > { %v3321_v38 = vpop.eup %3320  ;;  %v2049_v39 = vmul.f32 %v3319_v37, %v3317_v35 }
 0x5ed   : > { %v2048_v41 = vmul.f32 %v3388_v56, %v3321_v38  ;;  %v3323_v47 = vpop.eup %3322 }
 0x5ef   : > { %v2050_v56 = vadd.f32 %v2049_v39, %v2048_v41   ;;  %v2715_v42 = vpop.f32.mrb[8].mxu1 }
 0x5f0   : > { %v2716_v43 = vpop.f32.mrb[9].mxu1 }
 0x5f1   : > { %3324 = vtanh.f32 %v2050_v56  ;;  %v2717_v44 = vadd.f32 %v2716_v43, %v2715_v42  ;;  %v2718_v45 = vpop.f32.mrb[10].mxu1 }
 0x5f2   : > { %v2719_v46 = vpop.f32.mrb[11].mxu1 }
 0x5f3   : > { %v2302_v54 = vadd.f32 %v2717_v44, %v2611_v53 }
 0x5fb   : > { %v3325_v48 = vpop.eup %3324 }
 0x5fc   : > { %v2052_v60 = vmul.f32 %v3325_v48, %v3323_v47  }
 0x5fe   : > { %v2053_v51 = vpack.c.bf16 %v2052_v60, %v2052_v60 }
 0x600   : > { %2054 = vst [vmem:[#allocation4 + $0x8] sm:$0xf] %v2053_v51 }
 0x607   : > { %v3275_v52 = vld [vmem:[#allocation4 + $0x8] ss:$0 sps:$4 sm:$0xff]  }
 0x608   : > { %2851 = vmatmul.mubr.bf16.vlgmr.msra.gmra.mrb[16].mxu0 %v3275_v52 }
 0x6db   : > { %v2341_v55 = vpop.f32.mrb[16].mxu0 }
 0x6dc   : > { %v2342_v50 = vadd.f32 %v2341_v55, %v2302_v54  ;;  %v2852_v49 = vpop.f32.mrb[17].mxu0 }
 0x6dd   : > { %v2344_v57 = vpop.f32.mrb[18].mxu0 }
 0x6de   : > { %2640 = vst [vmem:[%s2380_s30 + $0x8] sm:$0xff] %v2342_v50  ;;  %2351 = vmax.xlane.f32.xlu1 %v2342_v50  ;;  %v2853_v58 = vpop.f32.mrb[19].mxu0 }
 0x76b   : > { %v2352_v59 = vpop.xlane.xlu1 %2351 }
 0x76c   : > { %vm2353_vm13 = vcmp.ge.f32.partialorder %v2342_v50, %v2352_v59 }
 0x76d   : > { %v2354_v61 = vsel %vm2353_vm13, %v726_v13, 128.0 }
 0x76e   : > { %2355 = vmin.xlane.f32.xlu0 %v2354_v61 }
 0x7fa   :  { %740 = sbr.rel (!%p738_p7) target bundleno = 558 (0x22e), region = 115 }
 0x7fb   : > { %v2356_v24 = vpop.xlane.xlu0 %2355 }
 0x7fc   : > { %v2898_v63 = vtrunc.f32 %v2356_v24 }
 0x7fe   : > { %v2899_v2 = vcvt.f32.s32 %v2898_v63 }
 0x800   : > { %v2365_v16 = vsel %vm2364_vm14, %v2642_v1, %v2899_v2  }
 0x801   :  { %2370 = vsyncpa [#allocation6], 1 }

</bundles_post_ra>
